<compile_context>
chip_gen: v7x
topology: tpu7x:2x2x1
jax: 0.10.0
libtpu: 0.0.40
codegen_flags: <defaults>
</compile_context>

<pallas_src>
import functools

import jax
import jax.numpy as jnp
from jax.experimental import pallas as pl
from jax.experimental.pallas import tpu as pltpu


def _round_up(x, m):
    return (x + m - 1) // m * m


# ----------------------------------------------------------------------------
# Pallas kernel: both Q heads for one batch tile, heads interleaved per layer.
# ----------------------------------------------------------------------------
def _critic_kernel(
    sa_ref,                        # [TB, Sp]        f32
    wcat_ref, bcat_ref,            # [Sp, 8*Hp] cd,  [1, 8*Hp] f32
    w2h_ref, w7h_ref,              # [Hp, Hp] cd     (layer-2 pair)
    w3h_ref, w8h_ref,              # [Hp, Hp] cd     (layer-3 pair)
    w4h_ref, w9h_ref,              # [Hp, Hp] cd     (layer-4 pair)
    w5r_ref, w10r_ref,             # [1, Hp] f32     (1-wide heads, VPU/XLU path)
    blast_ref,                     # [1, 128] f32    (b5 lane 0, b10 lane 1)
    out_ref,                       # [TB, 128] f32   (q1 lane 0, q2 lane 1)
):
    hp = w2h_ref.shape[0]
    w_cat = wcat_ref[...]
    cdt = w_cat.dtype
    sa = sa_ref[...].astype(cdt)

    # Fused sa projection for all 8 sa-consuming layers: one wide MXU pass.
    sa_proj = (jnp.dot(sa, w_cat, preferred_element_type=jnp.float32)
               + bcat_ref[...])                                   # [TB, 8Hp] f32

    def slab(j):                      # lane-aligned static slice (Hp % 128 == 0)
        return sa_proj[:, j * hp:(j + 1) * hp]

    # Layer 1 / 6.
    h1 = jnp.maximum(slab(0), 0.0)
    h2 = jnp.maximum(slab(4), 0.0)

    # Layers 2-4 / 7-9, the two independent heads interleaved so the LLO
    # scheduler can overlap one head's VPU epilogue with the other's MXU work.
    # relu(cat([h, sa]) @ W + b) == relu(h @ Wh + (sa @ Ws + b)).
    for k, (wa_ref, wb_ref) in enumerate(
            ((w2h_ref, w7h_ref), (w3h_ref, w8h_ref), (w4h_ref, w9h_ref)),
            start=1):
        a1 = jnp.dot(h1.astype(cdt), wa_ref[...],
                     preferred_element_type=jnp.float32)
        a2 = jnp.dot(h2.astype(cdt), wb_ref[...],
                     preferred_element_type=jnp.float32)
        h1 = jnp.maximum(a1 + slab(k), 0.0)
        h2 = jnp.maximum(a2 + slab(4 + k), 0.0)

    # Layer 5 / 10: 1-wide heads off the MXU (VPU multiply + XLU lane reduce).
    q1 = jnp.sum(h1 * w5r_ref[...], axis=-1, keepdims=True)       # [TB, 1]
    q2 = jnp.sum(h2 * w10r_ref[...], axis=-1, keepdims=True)      # [TB, 1]

    shape = out_ref.shape
    lane = jax.lax.broadcasted_iota(jnp.int32, shape, 1)
    out_ref[...] = (jnp.where(lane == 0, jnp.broadcast_to(q1, shape), 0.0)
                    + jnp.where(lane == 1, jnp.broadcast_to(q2, shape), 0.0)
                    + blast_ref[...])


# ----------------------------------------------------------------------------
# Parameter construction (mirrors PyTorch weight_init: orthogonal W, zero b).
# Stored in kernel layout [in, out] (PyTorch nn.Linear stores [out, in]).
# ----------------------------------------------------------------------------
def _orthogonal(key, rows, cols):
    n = max(rows, cols)
    a = jax.random.normal(key, (n, n), jnp.float32)
    q, r = jnp.linalg.qr(a)
    q = q * jnp.sign(jnp.diag(r))[None, :]
    return q[:rows, :cols]


def make_critic_params(key, state_dim, action_dim, hidden_dim=256):
    sa_dim = state_dim + action_dim
    in_dim = hidden_dim + sa_dim
    layer_shapes = [
        (hidden_dim, sa_dim),   # l1
        (hidden_dim, in_dim),   # l2
        (hidden_dim, in_dim),   # l3
        (hidden_dim, in_dim),   # l4
        (1, hidden_dim),        # l5
        (hidden_dim, sa_dim),   # l6
        (hidden_dim, in_dim),   # l7
        (hidden_dim, in_dim),   # l8
        (hidden_dim, in_dim),   # l9
        (1, hidden_dim),        # l10
    ]
    keys = jax.random.split(key, len(layer_shapes))
    params = {}
    for i, ((out_f, in_f), k) in enumerate(zip(layer_shapes, keys), start=1):
        w_pt = _orthogonal(k, out_f, in_f)           # PyTorch layout [out, in]
        params[f"w{i}"] = jnp.transpose(w_pt)        # kernel layout [in, out]
        params[f"b{i}"] = jnp.zeros((1, out_f), jnp.float32)
    return params


def prepare_kernel_params(params, hidden_dim, compute_dtype=jnp.bfloat16):
    """One-time (outside the jitted step) re-layout of weights for the kernel.

    bf16 is the default compute dtype for the MXU inputs (f32 accumulation);
    pass jnp.float32 for a bit-accurate debug/reference mode.  Note that in the
    bf16 path activations are re-rounded to bf16 before every matmul, so
    compare against a loose tolerance only.
    """
    H = hidden_dim
    sa_dim = params["w1"].shape[0]
    Hp = _round_up(H, 128)           # lane-aligned hidden width
    Sp = _round_up(sa_dim, 128)      # lane-aligned sa width

    def pad_to(w, rows, cols):
        return jnp.pad(w, ((0, rows - w.shape[0]), (0, cols - w.shape[1])))

    def split(w):   # [H + sa, H] -> ([Hp, Hp], [Sp, Hp]) zero-padded
        return pad_to(w[:H, :], Hp, Hp), pad_to(w[H:, :], Sp, Hp)

    w2h, w2s = split(params["w2"]); w3h, w3s = split(params["w3"]); w4h, w4s = split(params["w4"])
    w7h, w7s = split(params["w7"]); w8h, w8s = split(params["w8"]); w9h, w9s = split(params["w9"])

    w1p = pad_to(params["w1"], Sp, Hp)
    w6p = pad_to(params["w6"], Sp, Hp)

    # Fused sa-projection weight: [Sp, 8*Hp]; column-slab order matches kernel.
    w_cat = jnp.concatenate([w1p, w2s, w3s, w4s, w6p, w7s, w8s, w9s], axis=1)

    def pad_b(b):
        return pad_to(b, 1, Hp)

    b_cat = jnp.concatenate(
        [pad_b(params["b1"]), pad_b(params["b2"]), pad_b(params["b3"]),
         pad_b(params["b4"]), pad_b(params["b6"]), pad_b(params["b7"]),
         pad_b(params["b8"]), pad_b(params["b9"])], axis=1)

    # 1-wide heads as [1, Hp] rows for the VPU/XLU reduction (kept f32).
    w5r = pad_to(jnp.transpose(params["w5"]), 1, Hp)
    w10r = pad_to(jnp.transpose(params["w10"]), 1, Hp)
    b_last = jnp.concatenate(
        [params["b5"], params["b10"], jnp.zeros((1, 126), jnp.float32)], axis=1)

    cd = compute_dtype
    return {
        "w_cat": w_cat.astype(cd), "b_cat": b_cat.astype(jnp.float32),
        "w2h": w2h.astype(cd), "w3h": w3h.astype(cd), "w4h": w4h.astype(cd),
        "w7h": w7h.astype(cd), "w8h": w8h.astype(cd), "w9h": w9h.astype(cd),
        "w5r": w5r.astype(jnp.float32), "w10r": w10r.astype(jnp.float32),
        "b_last": b_last.astype(jnp.float32),
    }


# ----------------------------------------------------------------------------
# Forward wrapper: batch grid, resident weights, lane-dense merged output.
# ----------------------------------------------------------------------------
@functools.partial(jax.jit, static_argnames=("block_batch",))
def critic_forward(kparams, state, action, block_batch=1024):
    sa = jnp.concatenate([state, action], axis=1).astype(jnp.float32)
    B, sa_dim = sa.shape
    Sp = kparams["w_cat"].shape[0]
    Hp = kparams["w2h"].shape[0]
    if Sp != sa_dim:                       # lane-pad sa to match padded w_cat rows
        sa = jnp.pad(sa, ((0, 0), (0, Sp - sa_dim)))

    # Batch tile: multiple of 8 sublanes, never larger than the padded batch;
    # cap so there are >= 2 grid steps when possible (v7x megacore sharding).
    tb = min(block_batch, _round_up(B, 8))
    if B > 8:
        tb = min(tb, _round_up((B + 1) // 2, 8))
    b_pad = _round_up(B, tb)
    if b_pad != B:
        sa = jnp.pad(sa, ((0, b_pad - B), (0, 0)))

    grid = (b_pad // tb,)

    weight_order = ("w_cat", "b_cat", "w2h", "w7h", "w3h", "w8h",
                    "w4h", "w9h", "w5r", "w10r", "b_last")
    weight_args = tuple(kparams[k] for k in weight_order)

    in_specs = (
        [pl.BlockSpec((tb, Sp), lambda i: (i, 0))]                        # streamed batch tile
        + [pl.BlockSpec(w.shape, lambda i: (0, 0)) for w in weight_args]  # VMEM-resident
    )

    flops = 2 * b_pad * (Sp * 8 * Hp + 6 * Hp * Hp + 2 * Hp)
    bytes_accessed = (sa.size * sa.dtype.itemsize
                      + sum(w.size * w.dtype.itemsize for w in weight_args)
                      + b_pad * 128 * 4)

    out = pl.pallas_call(
        _critic_kernel,
        out_shape=jax.ShapeDtypeStruct((b_pad, 128), jnp.float32),
        grid=grid,
        in_specs=in_specs,
        out_specs=pl.BlockSpec((tb, 128), lambda i: (i, 0)),
        compiler_params=pltpu.CompilerParams(
            dimension_semantics=("parallel",),      # shards batch over v7x's 2 TCs
            vmem_limit_bytes=48 * 1024 * 1024,      # safe on v7x (64 MiB physical)
        ),
        cost_estimate=pl.CostEstimate(
            flops=flops, transcendentals=0, bytes_accessed=bytes_accessed),
    )(sa, *weight_args)

    q1 = out[:B, 0:1]
    q2 = out[:B, 1:2]
    return q1, q2


# ----------------------------------------------------------------------------
# Pure-JAX reference (semantically identical to the PyTorch forward).
# ----------------------------------------------------------------------------
def critic_reference(params, state, action):
    sa = jnp.concatenate([state, action], axis=1)

    def lin(x, i):
        return x @ params[f"w{i}"] + params[f"b{i}"]

    def head(l_first, l_a, l_b, l_c, l_last):
        q = jax.nn.relu(lin(sa, l_first))
        q = jnp.concatenate([q, sa], axis=1)
        q = jax.nn.relu(lin(q, l_a))
        q = jnp.concatenate([q, sa], axis=1)
        q = jax.nn.relu(lin(q, l_b))
        q = jnp.concatenate([q, sa], axis=1)
        q = jax.nn.relu(lin(q, l_c))
        return lin(q, l_last)

    return head(1, 2, 3, 4, 5), head(6, 7, 8, 9, 10)


if __name__ == "__main__":
    # Small shapes; batch chosen non-multiple of the tile to exercise padding
    # and a multi-step batch grid (block_batch=16 -> 3 grid steps).
    batch, state_dim, action_dim, hidden_dim = 40, 12, 4, 32

    key = jax.random.PRNGKey(0)
    k_params, k_state, k_action = jax.random.split(key, 3)

    params = make_critic_params(k_params, state_dim, action_dim, hidden_dim)
    state = jax.random.normal(k_state, (batch, state_dim), jnp.float32)
    action = jax.random.normal(k_action, (batch, action_dim), jnp.float32)

    q1_ref, q2_ref = critic_reference(params, state, action)

    # --- f32 debug/reference path: tight numerical check ---
    kp_f32 = prepare_kernel_params(params, hidden_dim, jnp.float32)
    q1, q2 = critic_forward(kp_f32, state, action, block_batch=16)
    q1 = jax.block_until_ready(q1)
    q2 = jax.block_until_ready(q2)
    assert q1.shape == (batch, 1) and q2.shape == (batch, 1)
    assert jnp.allclose(q1, q1_ref, atol=1e-4, rtol=1e-4)
    assert jnp.allclose(q2, q2_ref, atol=1e-4, rtol=1e-4)

    # --- bf16 default path (f32 accumulation): loose check against an f32
    #     reference that uses bf16-rounded weights.  Note the kernel also
    #     re-rounds activations to bf16 before each matmul, hence the loose
    #     tolerance — do not tighten this check.
    kp_bf16 = prepare_kernel_params(params, hidden_dim)   # default = bf16
    q1b, q2b = critic_forward(kp_bf16, state, action, block_batch=16)
    q1b = jax.block_until_ready(q1b)
    q2b = jax.block_until_ready(q2b)
    params_bf = {k: (v.astype(jnp.bfloat16).astype(jnp.float32)
                     if k.startswith("w") else v) for k, v in params.items()}
    q1_bref, q2_bref = critic_reference(params_bf, state, action)
    assert jnp.all(jnp.isfinite(q1b)) and jnp.all(jnp.isfinite(q2b))
    assert jnp.allclose(q1b, q1_bref, atol=1e-1, rtol=1e-1)
    assert jnp.allclose(q2b, q2_bref, atol=1e-1, rtol=1e-1)

    print("KERNEL_OK")
</pallas_src>

<mosaic_0001>
module attributes {stable_mosaic.version = 11 : i64} {
  func.func @_critic_kernel(%arg0: i32, %arg1: memref<16x128xf32, #tpu.memory_space<vmem>>, %arg2: memref<128x1024xf32, #tpu.memory_space<vmem>>, %arg3: memref<1x1024xf32, #tpu.memory_space<vmem>>, %arg4: memref<128x128xf32, #tpu.memory_space<vmem>>, %arg5: memref<128x128xf32, #tpu.memory_space<vmem>>, %arg6: memref<128x128xf32, #tpu.memory_space<vmem>>, %arg7: memref<128x128xf32, #tpu.memory_space<vmem>>, %arg8: memref<128x128xf32, #tpu.memory_space<vmem>>, %arg9: memref<128x128xf32, #tpu.memory_space<vmem>>, %arg10: memref<1x128xf32, #tpu.memory_space<vmem>>, %arg11: memref<1x128xf32, #tpu.memory_space<vmem>>, %arg12: memref<1x128xf32, #tpu.memory_space<vmem>>, %arg13: memref<16x128xf32, #tpu.memory_space<vmem>>) attributes {dimension_semantics = [#tpu.dimension_semantics<parallel>], iteration_bounds = array<i64: 3>, scalar_prefetch = 0 : i64, scratch_operands = 0 : i64, tpu.core_type = #tpu.core_type<tc>, window_params = [{transform_indices = @transform_0, window_bounds = array<i64: 16, 128>}, {pipeline_mode = #tpu.pipeline_mode<synchronous>, transform_indices = @transform_1, window_bounds = array<i64: 128, 1024>}, {pipeline_mode = #tpu.pipeline_mode<synchronous>, transform_indices = @transform_2, window_bounds = array<i64: 1, 1024>}, {pipeline_mode = #tpu.pipeline_mode<synchronous>, transform_indices = @transform_3, window_bounds = array<i64: 128, 128>}, {pipeline_mode = #tpu.pipeline_mode<synchronous>, transform_indices = @transform_4, window_bounds = array<i64: 128, 128>}, {pipeline_mode = #tpu.pipeline_mode<synchronous>, transform_indices = @transform_5, window_bounds = array<i64: 128, 128>}, {pipeline_mode = #tpu.pipeline_mode<synchronous>, transform_indices = @transform_6, window_bounds = array<i64: 128, 128>}, {pipeline_mode = #tpu.pipeline_mode<synchronous>, transform_indices = @transform_7, window_bounds = array<i64: 128, 128>}, {pipeline_mode = #tpu.pipeline_mode<synchronous>, transform_indices = @transform_8, window_bounds = array<i64: 128, 128>}, {pipeline_mode = #tpu.pipeline_mode<synchronous>, transform_indices = @transform_9, window_bounds = array<i64: 1, 128>}, {pipeline_mode = #tpu.pipeline_mode<synchronous>, transform_indices = @transform_10, window_bounds = array<i64: 1, 128>}, {pipeline_mode = #tpu.pipeline_mode<synchronous>, transform_indices = @transform_11, window_bounds = array<i64: 1, 128>}, {transform_indices = @transform_12, window_bounds = array<i64: 16, 128>}]} {
    %c0 = arith.constant 0 : index
    %c0_0 = arith.constant 0 : index
    %0 = vector.load %arg2[%c0, %c0_0] : memref<128x1024xf32, #tpu.memory_space<vmem>>, vector<128x1024xf32>
    %c0_1 = arith.constant 0 : index
    %c0_2 = arith.constant 0 : index
    %1 = vector.load %arg1[%c0_1, %c0_2] : memref<16x128xf32, #tpu.memory_space<vmem>>, vector<16x128xf32>
    %cst = arith.constant dense<0.000000e+00> : vector<16x1024xf32>
    %2 = tpu.matmul %1, %0, %cst {dimension_numbers = #tpu.dot_dimension_numbers<[1], [0], [0], [1], [0, 0, 1, 1], [], []>} : vector<16x128xf32>, vector<128x1024xf32>, vector<16x1024xf32> -> vector<16x1024xf32>
    %c0_3 = arith.constant 0 : index
    %c0_4 = arith.constant 0 : index
    %3 = vector.load %arg3[%c0_3, %c0_4] : memref<1x1024xf32, #tpu.memory_space<vmem>>, vector<1x1024xf32>
    %4 = vector.broadcast %3 : vector<1x1024xf32> to vector<16x1024xf32>
    %5 = arith.addf %2, %4 : vector<16x1024xf32>
    %6 = vector.extract_strided_slice %5 {offsets = [0, 0], sizes = [16, 128], strides = [1, 1]} : vector<16x1024xf32> to vector<16x128xf32>
    %cst_5 = arith.constant 0.000000e+00 : f32
    %7 = vector.broadcast %cst_5 : f32 to vector<16x128xf32>
    %8 = arith.maximumf %6, %7 : vector<16x128xf32>
    %9 = vector.extract_strided_slice %5 {offsets = [0, 512], sizes = [16, 128], strides = [1, 1]} : vector<16x1024xf32> to vector<16x128xf32>
    %cst_6 = arith.constant 0.000000e+00 : f32
    %10 = vector.broadcast %cst_6 : f32 to vector<16x128xf32>
    %11 = arith.maximumf %9, %10 : vector<16x128xf32>
    %c0_7 = arith.constant 0 : index
    %c0_8 = arith.constant 0 : index
    %12 = vector.load %arg4[%c0_7, %c0_8] : memref<128x128xf32, #tpu.memory_space<vmem>>, vector<128x128xf32>
    %cst_9 = arith.constant dense<0.000000e+00> : vector<16x128xf32>
    %13 = tpu.matmul %8, %12, %cst_9 {dimension_numbers = #tpu.dot_dimension_numbers<[1], [0], [0], [1], [0, 0, 1, 1], [], []>} : vector<16x128xf32>, vector<128x128xf32>, vector<16x128xf32> -> vector<16x128xf32>
    %c0_10 = arith.constant 0 : index
    %c0_11 = arith.constant 0 : index
    %14 = vector.load %arg5[%c0_10, %c0_11] : memref<128x128xf32, #tpu.memory_space<vmem>>, vector<128x128xf32>
    %cst_12 = arith.constant dense<0.000000e+00> : vector<16x128xf32>
    %15 = tpu.matmul %11, %14, %cst_12 {dimension_numbers = #tpu.dot_dimension_numbers<[1], [0], [0], [1], [0, 0, 1, 1], [], []>} : vector<16x128xf32>, vector<128x128xf32>, vector<16x128xf32> -> vector<16x128xf32>
    %16 = vector.extract_strided_slice %5 {offsets = [0, 128], sizes = [16, 128], strides = [1, 1]} : vector<16x1024xf32> to vector<16x128xf32>
    %17 = arith.addf %13, %16 : vector<16x128xf32>
    %cst_13 = arith.constant 0.000000e+00 : f32
    %18 = vector.broadcast %cst_13 : f32 to vector<16x128xf32>
    %19 = arith.maximumf %17, %18 : vector<16x128xf32>
    %20 = vector.extract_strided_slice %5 {offsets = [0, 640], sizes = [16, 128], strides = [1, 1]} : vector<16x1024xf32> to vector<16x128xf32>
    %21 = arith.addf %15, %20 : vector<16x128xf32>
    %cst_14 = arith.constant 0.000000e+00 : f32
    %22 = vector.broadcast %cst_14 : f32 to vector<16x128xf32>
    %23 = arith.maximumf %21, %22 : vector<16x128xf32>
    %c0_15 = arith.constant 0 : index
    %c0_16 = arith.constant 0 : index
    %24 = vector.load %arg6[%c0_15, %c0_16] : memref<128x128xf32, #tpu.memory_space<vmem>>, vector<128x128xf32>
    %cst_17 = arith.constant dense<0.000000e+00> : vector<16x128xf32>
    %25 = tpu.matmul %19, %24, %cst_17 {dimension_numbers = #tpu.dot_dimension_numbers<[1], [0], [0], [1], [0, 0, 1, 1], [], []>} : vector<16x128xf32>, vector<128x128xf32>, vector<16x128xf32> -> vector<16x128xf32>
    %c0_18 = arith.constant 0 : index
    %c0_19 = arith.constant 0 : index
    %26 = vector.load %arg7[%c0_18, %c0_19] : memref<128x128xf32, #tpu.memory_space<vmem>>, vector<128x128xf32>
    %cst_20 = arith.constant dense<0.000000e+00> : vector<16x128xf32>
    %27 = tpu.matmul %23, %26, %cst_20 {dimension_numbers = #tpu.dot_dimension_numbers<[1], [0], [0], [1], [0, 0, 1, 1], [], []>} : vector<16x128xf32>, vector<128x128xf32>, vector<16x128xf32> -> vector<16x128xf32>
    %28 = vector.extract_strided_slice %5 {offsets = [0, 256], sizes = [16, 128], strides = [1, 1]} : vector<16x1024xf32> to vector<16x128xf32>
    %29 = arith.addf %25, %28 : vector<16x128xf32>
    %cst_21 = arith.constant 0.000000e+00 : f32
    %30 = vector.broadcast %cst_21 : f32 to vector<16x128xf32>
    %31 = arith.maximumf %29, %30 : vector<16x128xf32>
    %32 = vector.extract_strided_slice %5 {offsets = [0, 768], sizes = [16, 128], strides = [1, 1]} : vector<16x1024xf32> to vector<16x128xf32>
    %33 = arith.addf %27, %32 : vector<16x128xf32>
    %cst_22 = arith.constant 0.000000e+00 : f32
    %34 = vector.broadcast %cst_22 : f32 to vector<16x128xf32>
    %35 = arith.maximumf %33, %34 : vector<16x128xf32>
    %c0_23 = arith.constant 0 : index
    %c0_24 = arith.constant 0 : index
    %36 = vector.load %arg8[%c0_23, %c0_24] : memref<128x128xf32, #tpu.memory_space<vmem>>, vector<128x128xf32>
    %cst_25 = arith.constant dense<0.000000e+00> : vector<16x128xf32>
    %37 = tpu.matmul %31, %36, %cst_25 {dimension_numbers = #tpu.dot_dimension_numbers<[1], [0], [0], [1], [0, 0, 1, 1], [], []>} : vector<16x128xf32>, vector<128x128xf32>, vector<16x128xf32> -> vector<16x128xf32>
    %c0_26 = arith.constant 0 : index
    %c0_27 = arith.constant 0 : index
    %38 = vector.load %arg9[%c0_26, %c0_27] : memref<128x128xf32, #tpu.memory_space<vmem>>, vector<128x128xf32>
    %cst_28 = arith.constant dense<0.000000e+00> : vector<16x128xf32>
    %39 = tpu.matmul %35, %38, %cst_28 {dimension_numbers = #tpu.dot_dimension_numbers<[1], [0], [0], [1], [0, 0, 1, 1], [], []>} : vector<16x128xf32>, vector<128x128xf32>, vector<16x128xf32> -> vector<16x128xf32>
    %40 = vector.extract_strided_slice %5 {offsets = [0, 384], sizes = [16, 128], strides = [1, 1]} : vector<16x1024xf32> to vector<16x128xf32>
    %41 = arith.addf %37, %40 : vector<16x128xf32>
    %cst_29 = arith.constant 0.000000e+00 : f32
    %42 = vector.broadcast %cst_29 : f32 to vector<16x128xf32>
    %43 = arith.maximumf %41, %42 : vector<16x128xf32>
    %44 = vector.extract_strided_slice %5 {offsets = [0, 896], sizes = [16, 128], strides = [1, 1]} : vector<16x1024xf32> to vector<16x128xf32>
    %45 = arith.addf %39, %44 : vector<16x128xf32>
    %cst_30 = arith.constant 0.000000e+00 : f32
    %46 = vector.broadcast %cst_30 : f32 to vector<16x128xf32>
    %47 = arith.maximumf %45, %46 : vector<16x128xf32>
    %c0_31 = arith.constant 0 : index
    %c0_32 = arith.constant 0 : index
    %48 = vector.load %arg10[%c0_31, %c0_32] : memref<1x128xf32, #tpu.memory_space<vmem>>, vector<1x128xf32>
    %49 = vector.broadcast %48 : vector<1x128xf32> to vector<16x128xf32>
    %50 = arith.mulf %43, %49 : vector<16x128xf32>
    %cst_33 = arith.constant dense<0.000000e+00> : vector<16xf32>
    %51 = vector.multi_reduction <add>, %50, %cst_33 [1] : vector<16x128xf32> to vector<16xf32>
    %52 = vector.shape_cast %51 : vector<16xf32> to vector<16x1xf32>
    %c0_34 = arith.constant 0 : index
    %c0_35 = arith.constant 0 : index
    %53 = vector.load %arg11[%c0_34, %c0_35] : memref<1x128xf32, #tpu.memory_space<vmem>>, vector<1x128xf32>
    %54 = vector.broadcast %53 : vector<1x128xf32> to vector<16x128xf32>
    %55 = arith.mulf %47, %54 : vector<16x128xf32>
    %cst_36 = arith.constant dense<0.000000e+00> : vector<16xf32>
    %56 = vector.multi_reduction <add>, %55, %cst_36 [1] : vector<16x128xf32> to vector<16xf32>
    %57 = vector.shape_cast %56 : vector<16xf32> to vector<16x1xf32>
    %58 = tpu.iota {dimensions = array<i32: 1>} : vector<16x128xi32>
    %c0_i32 = arith.constant 0 : i32
    %59 = vector.broadcast %c0_i32 : i32 to vector<16x128xi32>
    %60 = arith.cmpi eq, %58, %59 : vector<16x128xi32>
    %61 = vector.shape_cast %52 : vector<16x1xf32> to vector<16x1xf32>
    %62 = vector.broadcast %61 : vector<16x1xf32> to vector<16x128xf32>
    %cst_37 = arith.constant 0.000000e+00 : f32
    %63 = vector.broadcast %cst_37 : f32 to vector<16x128xf32>
    %64 = arith.select %60, %62, %63 : vector<16x128xi1>, vector<16x128xf32>
    %c1_i32 = arith.constant 1 : i32
    %65 = vector.broadcast %c1_i32 : i32 to vector<16x128xi32>
    %66 = arith.cmpi eq, %58, %65 : vector<16x128xi32>
    %67 = vector.shape_cast %57 : vector<16x1xf32> to vector<16x1xf32>
    %68 = vector.broadcast %67 : vector<16x1xf32> to vector<16x128xf32>
    %cst_38 = arith.constant 0.000000e+00 : f32
    %69 = vector.broadcast %cst_38 : f32 to vector<16x128xf32>
    %70 = arith.select %66, %68, %69 : vector<16x128xi1>, vector<16x128xf32>
    %71 = arith.addf %64, %70 : vector<16x128xf32>
    %c0_39 = arith.constant 0 : index
    %c0_40 = arith.constant 0 : index
    %72 = vector.load %arg12[%c0_39, %c0_40] : memref<1x128xf32, #tpu.memory_space<vmem>>, vector<1x128xf32>
    %73 = vector.broadcast %72 : vector<1x128xf32> to vector<16x128xf32>
    %74 = arith.addf %71, %73 : vector<16x128xf32>
    %c0_41 = arith.constant 0 : index
    %c0_42 = arith.constant 0 : index
    %75 = vector.load %arg13[%c0_41, %c0_42] : memref<16x128xf32, #tpu.memory_space<vmem>>, vector<16x128xf32>
    tpu.vector_store %arg13[%c0_41, %c0_42], %74 {strides = array<i32>} : memref<16x128xf32, #tpu.memory_space<vmem>>, vector<16x128xf32>,
    return
  }
  func.func @transform_0(%arg0: i32) -> (i32, i32) {
    %c0_i32 = arith.constant 0 : i32
    %c0_i32_0 = arith.constant 0 : i32
    return %arg0, %c0_i32 : i32, i32
  }
  func.func @transform_1(%arg0: i32) -> (i32, i32) {
    %c0_i32 = arith.constant 0 : i32
    %c0_i32_0 = arith.constant 0 : i32
    %c0_i32_1 = arith.constant 0 : i32
    return %c0_i32, %c0_i32_0 : i32, i32
  }
  func.func @transform_2(%arg0: i32) -> (i32, i32) {
    %c0_i32 = arith.constant 0 : i32
    %c0_i32_0 = arith.constant 0 : i32
    %c0_i32_1 = arith.constant 0 : i32
    return %c0_i32, %c0_i32_0 : i32, i32
  }
  func.func @transform_3(%arg0: i32) -> (i32, i32) {
    %c0_i32 = arith.constant 0 : i32
    %c0_i32_0 = arith.constant 0 : i32
    %c0_i32_1 = arith.constant 0 : i32
    return %c0_i32, %c0_i32_0 : i32, i32
  }
  func.func @transform_4(%arg0: i32) -> (i32, i32) {
    %c0_i32 = arith.constant 0 : i32
    %c0_i32_0 = arith.constant 0 : i32
    %c0_i32_1 = arith.constant 0 : i32
    return %c0_i32, %c0_i32_0 : i32, i32
  }
  func.func @transform_5(%arg0: i32) -> (i32, i32) {
    %c0_i32 = arith.constant 0 : i32
    %c0_i32_0 = arith.constant 0 : i32
    %c0_i32_1 = arith.constant 0 : i32
    return %c0_i32, %c0_i32_0 : i32, i32
  }
  func.func @transform_6(%arg0: i32) -> (i32, i32) {
    %c0_i32 = arith.constant 0 : i32
    %c0_i32_0 = arith.constant 0 : i32
    %c0_i32_1 = arith.constant 0 : i32
    return %c0_i32, %c0_i32_0 : i32, i32
  }
  func.func @transform_7(%arg0: i32) -> (i32, i32) {
    %c0_i32 = arith.constant 0 : i32
    %c0_i32_0 = arith.constant 0 : i32
    %c0_i32_1 = arith.constant 0 : i32
    return %c0_i32, %c0_i32_0 : i32, i32
  }
  func.func @transform_8(%arg0: i32) -> (i32, i32) {
    %c0_i32 = arith.constant 0 : i32
    %c0_i32_0 = arith.constant 0 : i32
    %c0_i32_1 = arith.constant 0 : i32
    return %c0_i32, %c0_i32_0 : i32, i32
  }
  func.func @transform_9(%arg0: i32) -> (i32, i32) {
    %c0_i32 = arith.constant 0 : i32
    %c0_i32_0 = arith.constant 0 : i32
    %c0_i32_1 = arith.constant 0 : i32
    return %c0_i32, %c0_i32_0 : i32, i32
  }
  func.func @transform_10(%arg0: i32) -> (i32, i32) {
    %c0_i32 = arith.constant 0 : i32
    %c0_i32_0 = arith.constant 0 : i32
    %c0_i32_1 = arith.constant 0 : i32
    return %c0_i32, %c0_i32_0 : i32, i32
  }
  func.func @transform_11(%arg0: i32) -> (i32, i32) {
    %c0_i32 = arith.constant 0 : i32
    %c0_i32_0 = arith.constant 0 : i32
    %c0_i32_1 = arith.constant 0 : i32
    return %c0_i32, %c0_i32_0 : i32, i32
  }
  func.func @transform_12(%arg0: i32) -> (i32, i32) {
    %c0_i32 = arith.constant 0 : i32
    %c0_i32_0 = arith.constant 0 : i32
    return %arg0, %c0_i32 : i32, i32
  }
}

</mosaic_0001>

<bundles_post_ra>
// kernel: critic_forward.1
= control target key start
LH: loop header
LB: loop body
LE: loop exit
PB: predicated region body
PF: predicated region fallthrough
CT: control target
= control target key end

     0   :  { %s3077_s0 = inlined_call_operand.vmem [shape: f32[48,128], index: 0, kind: input, shape index: {}]   ;;  %s3078_s1 = inlined_call_operand.hbm [shape: f32[128,1024], index: 1, kind: input, shape index: {}]   ;;  %s3079_s2 = inlined_call_operand.vmem [shape: f32[1,1024], index: 2, kind: input, shape index: {}]   ;;  %s3080_s3 = inlined_call_operand.vmem [shape: f32[128,128], index: 3, kind: input, shape index: {}]   ;;  %s3081_s4 = inlined_call_operand.hbm [shape: f32[128,128], index: 4, kind: input, shape index: {}]   ;;  %s3082_s5 = inlined_call_operand.hbm [shape: f32[128,128], index: 5, kind: input, shape index: {}]   ;;  %s3083_s6 = inlined_call_operand.hbm [shape: f32[128,128], index: 6, kind: input, shape index: {}]   ;;  %s3084_s7 = inlined_call_operand.hbm [shape: f32[128,128], index: 7, kind: input, shape index: {}]   ;;  %s3085_s8 = inlined_call_operand.hbm [shape: f32[128,128], index: 8, kind: input, shape index: {}]   ;;  %s3086_s9 = inlined_call_operand.vmem [shape: f32[1,128], index: 9, kind: input, shape index: {}]   ;;  %s3087_s10 = inlined_call_operand.vmem [shape: f32[1,128], index: 10, kind: input, shape index: {}]   ;;  %s3088_s11 = inlined_call_operand.vmem [shape: f32[1,128], index: 11, kind: input, shape index: {}]   ;;  %s3089_s12 = inlined_call_operand.vmem [shape: f32[48,128], index: 12, kind: output, shape index: {}]  }
   0x1   :  { %3098 = sst [smem:[#allocation16_spill]] %s3089_s12 }
   0x2   :  { %17 = vsyncpa [#allocation3], 0 }
   0x3   :  { %18 = vsyncpa [#allocation5], 0 }
   0x4   :  { %19 = vsyncpa [#allocation8], 0 }
   0x5   :  { %20 = vsyncpa [#allocation11], 0  ;;  %s2716_s21 = smov 0  }
   0x6 LB: > { %s2640_s22 = smov [#allocation4]   ;;  %s3090_s24 = sadd.s32 4294967295, %s2638_s21   ;;  %s2638_s21 = sphi %s2716_s21, %s26_s21  }
   0x7   : > { %s345_s23 = sshll.u32 %s2640_s22, 4  ;;  %p1712_p0 = scmp.ge.s32.totalorder %s2638_s21, 1  ;;  %s2730_s23 = int_to_ptr.vmem [resolvable:$true] %s345_s23 }
   0x8   : > { %p314_p1 = scmp.lt.s32.totalorder %s2638_s21, 4  ;;  %p2726_p2 = scmp.eq.s32.totalorder %s3090_s24, 0 }
   0x9   : > { %s2641_s27 = smov [#allocation7]   ;;  %s2642_s30 = smov [#allocation2]  }
   0xa   : > { %s3099_s25 = scalar_select %p2726_p2, 1, 0 }
   0xb   : > { %p2732_p3 = pnand %p1712_p0, %p314_p1  ;;  %s371_s28 = sshll.u32 %s2641_s27, 4  ;;  %s2738_s28 = int_to_ptr.vmem [resolvable:$true] %s371_s28 }
   0xc   : > { %s326_s13 = sshll.u32 %s2642_s30, 4  ;;  %s2448_s16 = scalar_lea.hbm %s3081_s4, 2048  ;;  %s2746_s13 = int_to_ptr.vmem [resolvable:$true] %s326_s13 }
   0xd   : > { %s3100_s26 = scalar_select %p2732_p3, 1, 0 }
   0xe   : > { %p2398_p4 = pneg %p2732_p3  ;;  %p2449_p6 = scmp.ne.s32.totalorder %s3081_s4, %s2448_s16 }
   0xf   : > { %p2455_p10 = scmp.lt.u32.totalorder %s2448_s16, %s3081_s4 }
  0x10   : > { %p2742_p5 = pnand %p2726_p2, %p2398_p4 }
  0x12   : > { %p2756_p7 = pneg %p2742_p5 }
  0x14   : > { %p2451_p8 = pnand %p2756_p7, %p2449_p6 }
  0x16   : > { %p2452_p9 = pneg %p2451_p8 }
  0x18   : > { %p2457_p11 = pnand %p2455_p10, %p2452_p9 }
  0x1a   : > { %2460 = shalt.err (!%p2457_p11)
}
  0x1b   : > { %s2461_s27 = scalar_lea.vmem %s2730_s23, 2048  ;;  %p2469_p1 = scmp.lt.s32.totalorder %s2730_s23, %s2730_s23 }
  0x1c   : > { %p2462_p12 = scmp.ne.s32.totalorder %s2730_s23, %s2461_s27  ;;  %p2470_p4 = scmp.lt.s32.totalorder %s2461_s27, %s2461_s27 }
  0x1e   : > { %p2464_p13 = pnand %p2462_p12, %p2756_p7  ;;  %p2471_p6 = por %p2470_p4, %p2469_p1 }
  0x20   : > { %p2465_p0 = pneg %p2464_p13 }
  0x22   : > { %p2472_p8 = pnand %p2471_p6, %p2465_p0 }
  0x24   : > { %2475 = shalt.err (!%p2472_p8)
}
  0x25   : > { %s3091_s30 = smov 128   ;;  %s3093_s14 = smov 8  }
  0x26   : > { %2404 = dma.hbm_to_vmem [thread:$0]  (!%p2742_p5), %s3081_s4, 2048, %s2730_s23, [#allocation5], %s3091_s30, %s3091_s30, %s3093_s14  }
  0x27   : > { %s2476_s20 = scalar_lea.hbm %s3083_s6, 2048 }
  0x28   : > { %p2477_p9 = scmp.ne.s32.totalorder %s3083_s6, %s2476_s20  ;;  %p2483_p12 = scmp.lt.u32.totalorder %s2476_s20, %s3083_s6 }
  0x2a   : > { %p2479_p10 = pnand %p2477_p9, %p2756_p7 }
  0x2c   : > { %p2480_p11 = pneg %p2479_p10 }
  0x2e   : > { %p2485_p13 = pnand %p2483_p12, %p2480_p11 }
  0x30   : > { %2488 = shalt.err (!%p2485_p13)
}
  0x31   : > { %s2489_s23 = scalar_lea.vmem %s2738_s28, 2048  ;;  %p2497_p6 = scmp.lt.s32.totalorder %s2738_s28, %s2738_s28 }
  0x32   : > { %p2490_p0 = scmp.ne.s32.totalorder %s2738_s28, %s2489_s23  ;;  %p2498_p8 = scmp.lt.s32.totalorder %s2489_s23, %s2489_s23 }
  0x34   : > { %p2492_p1 = pnand %p2490_p0, %p2756_p7  ;;  %p2499_p9 = por %p2498_p8, %p2497_p6 }
  0x36   : > { %p2493_p4 = pneg %p2492_p1 }
  0x38   : > { %p2500_p10 = pnand %p2499_p9, %p2493_p4 }
  0x3a   : > { %2503 = shalt.err (!%p2500_p10)
}
  0x3b   : > { %2410 = dma.hbm_to_vmem [thread:$0]  (!%p2742_p5), %s3083_s6, 2048, %s2738_s28, [#allocation8], %s3091_s30, %s3091_s30, %s3093_s14  }
  0x3c   : > { %s2504_s17 = scalar_lea.hbm %s3078_s1, 16384 }
  0x3d   : > { %p2505_p11 = scmp.ne.s32.totalorder %s3078_s1, %s2504_s17  ;;  %p2511_p0 = scmp.lt.u32.totalorder %s2504_s17, %s3078_s1 }
  0x3f   : > { %p2507_p12 = pnand %p2505_p11, %p2756_p7 }
  0x41   : > { %p2508_p13 = pneg %p2507_p12 }
  0x43   : > { %p2513_p1 = pnand %p2511_p0, %p2508_p13 }
  0x45   : > { %2516 = shalt.err (!%p2513_p1)
}
  0x46   : > { %s2517_s28 = scalar_lea.vmem %s2746_s13, 16384  ;;  %p2525_p9 = scmp.lt.s32.totalorder %s2746_s13, %s2746_s13 }
  0x47   : > { %p2518_p4 = scmp.ne.s32.totalorder %s2746_s13, %s2517_s28  ;;  %p2526_p10 = scmp.lt.s32.totalorder %s2517_s28, %s2517_s28 }
  0x49   : > { %p2520_p6 = pnand %p2518_p4, %p2756_p7  ;;  %p2527_p11 = por %p2526_p10, %p2525_p9 }
  0x4b   : > { %p2521_p8 = pneg %p2520_p6 }
  0x4d   : > { %p2528_p12 = pnand %p2527_p11, %p2521_p8 }
  0x4f   : > { %2531 = shalt.err (!%p2528_p12)
}
  0x50   : > { %s2645_s23 = smov 1024   ;;  %s2646_s12 = smov 64  }
  0x51   : > { %2401 = dma.hbm_to_vmem [thread:$0]  (!%p2742_p5), %s3078_s1, 16384, %s2746_s13, [#allocation3], %s2645_s23, %s2645_s23, %s2646_s12  }
  0x52   : > { %s2647_s16 = smov [#allocation6]   ;;  %s2648_s18 = smov [#allocation9]  }
  0x53   : > { %s358_s17 = sshll.u32 %s2647_s16, 4  ;;  %s384_s20 = sshll.u32 %s2648_s18, 4  ;;  %s359_s17 = int_to_ptr.vmem [resolvable:$true] %s358_s17  ;;  %s2829_s20 = int_to_ptr.vmem [resolvable:$true] %s384_s20 }
  0x54   : > { %s2532_s28 = scalar_lea.hbm %s3082_s5, 2048 }
  0x55   : > { %p2533_p13 = scmp.ne.s32.totalorder %s3082_s5, %s2532_s28  ;;  %p2539_p4 = scmp.lt.u32.totalorder %s2532_s28, %s3082_s5 }
  0x57   : > { %p2535_p0 = pnand %p2533_p13, %p2756_p7 }
  0x59   : > { %p2536_p1 = pneg %p2535_p0 }
  0x5b   : > { %p2541_p6 = pnand %p2539_p4, %p2536_p1 }
  0x5d   : > { %2544 = shalt.err (!%p2541_p6)
}
  0x5e   : > { %s2545_s23 = scalar_lea.vmem %s359_s17, 2048  ;;  %p2553_p11 = scmp.lt.s32.totalorder %s359_s17, %s359_s17 }
  0x5f   : > { %p2546_p8 = scmp.ne.s32.totalorder %s359_s17, %s2545_s23  ;;  %p2554_p12 = scmp.lt.s32.totalorder %s2545_s23, %s2545_s23 }
  0x61   : > { %p2548_p9 = pnand %p2546_p8, %p2756_p7  ;;  %p2555_p2 = por %p2554_p12, %p2553_p11 }
  0x63   : > { %p2549_p10 = pneg %p2548_p9 }
  0x65   : > { %p2556_p3 = pnand %p2555_p2, %p2549_p10 }
  0x67   : > { %2559 = shalt.err (!%p2556_p3)
}
  0x68   : > { %s3103_s30 = smov 8   ;;  %s3104_s14 = smov 128  }
  0x69   : > { %2407 = dma.hbm_to_vmem [thread:$0]  (!%p2742_p5), %s3082_s5, 2048, %s359_s17, [#allocation5], %s3104_s14, %s3104_s14, %s3103_s30  }
  0x6a   : > { %s2560_s22 = scalar_lea.hbm %s3084_s7, 2048 }
  0x6b   : > { %p2561_p13 = scmp.ne.s32.totalorder %s3084_s7, %s2560_s22  ;;  %p2567_p0 = scmp.lt.u32.totalorder %s2560_s22, %s3084_s7 }
  0x6d   : > { %p2563_p2 = pnand %p2561_p13, %p2756_p7 }
  0x6f   : > { %p2564_p3 = pneg %p2563_p2 }
  0x71   : > { %p2569_p1 = pnand %p2567_p0, %p2564_p3 }
  0x73   : > { %2572 = shalt.err (!%p2569_p1)
}
  0x74   : > { %s2573_s17 = scalar_lea.vmem %s2829_s20, 2048  ;;  %p2581_p9 = scmp.lt.s32.totalorder %s2829_s20, %s2829_s20 }
  0x75   : > { %p2574_p4 = scmp.ne.s32.totalorder %s2829_s20, %s2573_s17  ;;  %p2582_p10 = scmp.lt.s32.totalorder %s2573_s17, %s2573_s17 }
  0x77   : > { %p2576_p6 = pnand %p2574_p4, %p2756_p7  ;;  %p2583_p11 = por %p2582_p10, %p2581_p9 }
  0x79   : > { %p2577_p8 = pneg %p2576_p6 }
  0x7b   : > { %p2584_p12 = pnand %p2583_p11, %p2577_p8 }
  0x7d   : > { %2587 = shalt.err (!%p2584_p12)
}
  0x7e   : > { %2413 = dma.hbm_to_vmem [thread:$0]  (!%p2742_p5), %s3084_s7, 2048, %s2829_s20, [#allocation8], %s3104_s14, %s3104_s14, %s3103_s30  }
  0x7f   : > { %s2649_s15 = smov [#allocation10]   ;;  %s2588_s27 = scalar_lea.hbm %s3085_s8, 2048 }
  0x80   : > { %s397_s16 = sshll.u32 %s2649_s15, 4  ;;  %p2589_p13 = scmp.ne.s32.totalorder %s3085_s8, %s2588_s27  ;;  %s398_s16 = int_to_ptr.vmem [resolvable:$true] %s397_s16 }
  0x81   : > { %p2595_p0 = scmp.lt.u32.totalorder %s2588_s27, %s3085_s8 }
  0x82   : > { %p2591_p2 = pnand %p2589_p13, %p2756_p7 }
  0x84   : > { %p2592_p3 = pneg %p2591_p2 }
  0x86   : > { %p2597_p1 = pnand %p2595_p0, %p2592_p3 }
  0x88   : > { %2600 = shalt.err (!%p2597_p1)
}
  0x89   : > { %s2601_s20 = scalar_lea.vmem %s398_s16, 2048  ;;  %p2609_p9 = scmp.lt.s32.totalorder %s398_s16, %s398_s16 }
  0x8a   : > { %p2602_p4 = scmp.ne.s32.totalorder %s398_s16, %s2601_s20  ;;  %p2610_p10 = scmp.lt.s32.totalorder %s2601_s20, %s2601_s20 }
  0x8c   : > { %p2604_p6 = pnand %p2602_p4, %p2756_p7  ;;  %p2611_p11 = por %p2610_p10, %p2609_p9 }
  0x8e   : > { %p2605_p8 = pneg %p2604_p6 }
  0x90   : > { %p2612_p12 = pnand %p2611_p11, %p2605_p8 }
  0x92   : > { %2615 = shalt.err (!%p2612_p12)
}
  0x93   : > { %2416 = dma.hbm_to_vmem [thread:$0]  (!%p2742_p5), %s3085_s8, 2048, %s398_s16, [#allocation11], %s3104_s14, %s3104_s14, %s3103_s30  }
  0x94   : > { %p3105_p13 = scmp.ne.s32.totalorder %s3100_s26, 0 }
  0x95   : > { %p3106_p7 = scmp.ne.s32.totalorder (!%p3105_p13), %s3099_s25, 0 }
  0x96   : > { %431 = sbr.rel (%p3105_p13) target bundleno = 1255 (0x4e7), region = 68 }
  0x9d   : > { %2621 = dma.done.wait (%p3106_p7), [#allocation3], 16384  }
  0x9e   : > { %2623 = vsyncadd (%p3106_p7), [#allocation3], 4294950912 }
  0x9f   : > { %2625 = dma.done.wait (%p3106_p7), [#allocation5], 4096  }
  0xa0   : > { %2627 = vsyncadd (%p3106_p7), [#allocation5], 4294963200 }
  0xa1   : > { %2629 = dma.done.wait (%p3106_p7), [#allocation8], 4096  }
  0xa2   : > { %2631 = vsyncadd (%p3106_p7), [#allocation8], 4294963200 }
  0xa3   : > { %2633 = dma.done.wait (%p3106_p7), [#allocation11], 2048  }
  0xa4   : > { %2635 = vsyncadd (%p3106_p7), [#allocation11], 4294965248  ;;  %v2650_v0 = vmov 0.0   ;;  %v506_v1 = vld [vmem:[#allocation2 + $0x8] sm:$0xff]  ;;  %v505_v3 = vld [vmem:[#allocation2] sm:$0xff]  ;;  %s3107_s25 = sadd.s32 4294967295, %s2638_s21  }
  0xa5   : > { %741 = vmatprep.mubr.f32.mxu0 %v2650_v0  ;;  %818 = vmatprep.mubr.f32.mxu1 %v2650_v0  ;;  %v514_v2 = vld [vmem:[#allocation2 + $0x48] sm:$0xff]  ;;  %v513_v5 = vld [vmem:[#allocation2 + $0x40] sm:$0xff]  ;;  %s1727_s26 = sshll.u32 %s3107_s25, 1  ;;  %v508_v44 = vld [vmem:[#allocation2 + $0x18] sm:$0xff]  ;;  %s3108_s23 = sld [smem:[#allocation16_spill]] }
  0xa6   : > { %v2054_v4 = vpack.c.bf16 %v514_v2, %v506_v1  ;;  %v522_v6 = vld [vmem:[#allocation2 + $0x88] sm:$0xff]  ;;  %v2056_v8 = vpack.c.bf16 %v513_v5, %v505_v3  ;;  %v521_v10 = vld [vmem:[#allocation2 + $0x80] sm:$0xff]  ;;  %p494_p5 = scmp.lt.s32.totalorder %s1727_s26, 5  ;;  %v516_v45 = vld [vmem:[#allocation2 + $0x58] sm:$0xff] }
  0xa7   : > { %v530_v7 = vld [vmem:[#allocation2 + $0xc8] sm:$0xff]  ;;  %v529_v11 = vld [vmem:[#allocation2 + $0xc0] sm:$0xff]  ;;  %v507_v46 = vld [vmem:[#allocation2 + $0x10] sm:$0xff]  ;;  %v2086_v47 = vpack.c.bf16 %v516_v45, %v508_v44 }
  0xa8   : > { %v2058_v9 = vpack.c.bf16 %v530_v7, %v522_v6  ;;  %v538_v12 = vld [vmem:[#allocation2 + $0x108] sm:$0xff]  ;;  %2055 = vmatprep.subr.bf16.mxu0 %v2054_v4  ;;  %v2060_v14 = vpack.c.bf16 %v529_v11, %v521_v10  ;;  %v537_v16 = vld [vmem:[#allocation2 + $0x100] sm:$0xff]  ;;  %s3110_s26 = smov (!%p494_p5, %s1727_s26), 5  ;;  %v515_v48 = vld [vmem:[#allocation2 + $0x50] sm:$0xff] }
  0xa9   : > { %v546_v13 = vld [vmem:[#allocation2 + $0x148] sm:$0xff]  ;;  %2057 = vmatpush1.bf16.msra.mxu0 %v2056_v8  ;;  %v545_v17 = vld [vmem:[#allocation2 + $0x140] sm:$0xff]  ;;  %v524_v49 = vld [vmem:[#allocation2 + $0x98] sm:$0xff]  ;;  %v2088_v52 = vpack.c.bf16 %v515_v48, %v507_v46  ;;  %2087 = vmatprep.subr.bf16.mxu1 %v2086_v47  ;;  %s1728_s29 = sshll.u32 %s3110_s26, 3 }
  0xaa   : > { %2059 = vmatprep.subr.bf16.mxu0 %v2058_v9  ;;  %v2062_v15 = vpack.c.bf16 %v546_v13, %v538_v12  ;;  %v554_v18 = vld [vmem:[#allocation2 + $0x188] sm:$0xff]  ;;  %v2064_v20 = vpack.c.bf16 %v545_v17, %v537_v16  ;;  %v553_v22 = vld [vmem:[#allocation2 + $0x180] sm:$0xff]  ;;  %v532_v50 = vld [vmem:[#allocation2 + $0xd8] sm:$0xff]  ;;  %s2929_s14 = scalar_lea.vmem %s3077_s0, %s1728_s29 }
  0xab   : > { %v562_v19 = vld [vmem:[#allocation2 + $0x1c8] sm:$0xff]  ;;  %v561_v23 = vld [vmem:[#allocation2 + $0x1c0] sm:$0xff]  ;;  %v2090_v53 = vpack.c.bf16 %v532_v50, %v524_v49  ;;  %v523_v54 = vld [vmem:[#allocation2 + $0x90] sm:$0xff]  ;;  %2089 = vmatpush1.bf16.msra.mxu1 %v2088_v52  ;;  %s503_s12 = scalar_lea.vmem %s3108_s23, %s1728_s29 }
  0xac   : > { %v2066_v21 = vpack.c.bf16 %v562_v19, %v554_v18  ;;  %v570_v24 = vld [vmem:[#allocation2 + $0x208] sm:$0xff]  ;;  %v2068_v26 = vpack.c.bf16 %v561_v23, %v553_v22  ;;  %v569_v28 = vld [vmem:[#allocation2 + $0x200] sm:$0xff]  ;;  %v531_v55 = vld [vmem:[#allocation2 + $0xd0] sm:$0xff] }
  0xad   : > { %2061 = vmatpush1.bf16.msra.mxu0 %v2060_v14  ;;  %v578_v25 = vld [vmem:[#allocation2 + $0x248] sm:$0xff]  ;;  %v577_v29 = vld [vmem:[#allocation2 + $0x240] sm:$0xff]  ;;  %v540_v56 = vld [vmem:[#allocation2 + $0x118] sm:$0xff]  ;;  %v2092_v63 = vpack.c.bf16 %v531_v55, %v523_v54  ;;  %2091 = vmatprep.subr.bf16.mxu1 %v2090_v53 }
  0xae   : > { %2063 = vmatprep.subr.bf16.mxu0 %v2062_v15  ;;  %v2070_v27 = vpack.c.bf16 %v578_v25, %v570_v24  ;;  %v586_v30 = vld [vmem:[#allocation2 + $0x288] sm:$0xff]  ;;  %v2072_v32 = vpack.c.bf16 %v577_v29, %v569_v28  ;;  %v585_v34 = vld [vmem:[#allocation2 + $0x280] sm:$0xff]  ;;  %v548_v60 = vld [vmem:[#allocation2 + $0x158] sm:$0xff] }
  0xaf   : > { %v594_v31 = vld [vmem:[#allocation2 + $0x2c8] sm:$0xff]  ;;  %v593_v35 = vld [vmem:[#allocation2 + $0x2c0] sm:$0xff]  ;;  %v2094_v1 = vpack.c.bf16 %v548_v60, %v540_v56  ;;  %v539_v2 = vld [vmem:[#allocation2 + $0x110] sm:$0xff]  ;;  %2093 = vmatpush1.bf16.msra.mxu1 %v2092_v63 }
  0xb0   : > { %v2074_v33 = vpack.c.bf16 %v594_v31, %v586_v30  ;;  %v602_v36 = vld [vmem:[#allocation2 + $0x308] sm:$0xff]  ;;  %v2076_v38 = vpack.c.bf16 %v593_v35, %v585_v34  ;;  %v601_v39 = vld [vmem:[#allocation2 + $0x300] sm:$0xff]  ;;  %v547_v3 = vld [vmem:[#allocation2 + $0x150] sm:$0xff] }
  0xb1   : > { %2065 = vmatpush1.bf16.msra.mxu0 %v2064_v20  ;;  %v610_v37 = vld [vmem:[#allocation2 + $0x348] sm:$0xff]  ;;  %v609_v41 = vld [vmem:[#allocation2 + $0x340] sm:$0xff]  ;;  %v556_v5 = vld [vmem:[#allocation2 + $0x198] sm:$0xff]  ;;  %v2096_v12 = vpack.c.bf16 %v547_v3, %v539_v2  ;;  %2095 = vmatprep.subr.bf16.mxu1 %v2094_v1 }
  0xb2   : > { %2067 = vmatprep.subr.bf16.mxu0 %v2066_v21  ;;  %v2078_v40 = vpack.c.bf16 %v610_v37, %v602_v36  ;;  %v618_v42 = vld [vmem:[#allocation2 + $0x388] sm:$0xff]  ;;  %v2080_v51 = vpack.c.bf16 %v609_v41, %v601_v39  ;;  %v617_v58 = vld [vmem:[#allocation2 + $0x380] sm:$0xff]  ;;  %v564_v6 = vld [vmem:[#allocation2 + $0x1d8] sm:$0xff] }
  0xb3   : > { %v626_v43 = vld [vmem:[#allocation2 + $0x3c8] sm:$0xff]  ;;  %v625_v59 = vld [vmem:[#allocation2 + $0x3c0] sm:$0xff]  ;;  %v2098_v13 = vpack.c.bf16 %v564_v6, %v556_v5  ;;  %v555_v14 = vld [vmem:[#allocation2 + $0x190] sm:$0xff]  ;;  %2097 = vmatpush1.bf16.msra.mxu1 %v2096_v12 }
  0xb4   : > { %v2082_v57 = vpack.c.bf16 %v626_v43, %v618_v42  ;;  %v510_v61 = vld [vmem:[#allocation2 + $0x28] sm:$0xff]  ;;  %v2084_v4 = vpack.c.bf16 %v625_v59, %v617_v58  ;;  %v509_v8 = vld [vmem:[#allocation2 + $0x20] sm:$0xff]  ;;  %v563_v15 = vld [vmem:[#allocation2 + $0x1d0] sm:$0xff] }
  0xb5   : > { %2069 = vmatpush1.bf16.msra.mxu0 %v2068_v26  ;;  %v518_v62 = vld [vmem:[#allocation2 + $0x68] sm:$0xff]  ;;  %v517_v9 = vld [vmem:[#allocation2 + $0x60] sm:$0xff]  ;;  %v572_v18 = vld [vmem:[#allocation2 + $0x218] sm:$0xff]  ;;  %v2100_v25 = vpack.c.bf16 %v563_v15, %v555_v14  ;;  %2099 = vmatprep.subr.bf16.mxu1 %v2098_v13 }
  0xb6   : > { %2071 = vmatprep.subr.bf16.mxu0 %v2070_v27  ;;  %v2118_v7 = vpack.c.bf16 %v518_v62, %v510_v61  ;;  %v526_v10 = vld [vmem:[#allocation2 + $0xa8] sm:$0xff]  ;;  %v2932_v16 = vld [vmem:[%s2929_s14] sm:$0xff]  ;;  %v2120_v17 = vpack.c.bf16 %v517_v9, %v509_v8  ;;  %v580_v19 = vld [vmem:[#allocation2 + $0x258] sm:$0xff] }
  0xb7   : > { %v534_v11 = vld [vmem:[#allocation2 + $0xe8] sm:$0xff]  ;;  %v525_v21 = vld [vmem:[#allocation2 + $0xa0] sm:$0xff]  ;;  %v2102_v26 = vpack.c.bf16 %v580_v19, %v572_v18  ;;  %v571_v27 = vld [vmem:[#allocation2 + $0x210] sm:$0xff]  ;;  %2101 = vmatpush1.bf16.msra.mxu1 %v2100_v25 }
  0xb8   : > { %v2122_v20 = vpack.c.bf16 %v534_v11, %v526_v10  ;;  %v533_v22 = vld [vmem:[#allocation2 + $0xe0] sm:$0xff]  ;;  %v542_v23 = vld [vmem:[#allocation2 + $0x128] sm:$0xff]  ;;  %v579_v28 = vld [vmem:[#allocation2 + $0x250] sm:$0xff] }
  0xb9   : > { %2073 = vmatpush1.bf16.msra.mxu0 %v2072_v32  ;;  %v550_v24 = vld [vmem:[#allocation2 + $0x168] sm:$0xff]  ;;  %v2124_v30 = vpack.c.bf16 %v533_v22, %v525_v21  ;;  %v588_v31 = vld [vmem:[#allocation2 + $0x298] sm:$0xff]  ;;  %v541_v34 = vld [vmem:[#allocation2 + $0x120] sm:$0xff]  ;;  %2103 = vmatprep.subr.bf16.mxu1 %v2102_v26 }
  0xba   : > { %2075 = vmatprep.subr.bf16.mxu0 %v2074_v33  ;;  %v2937_v29 = vld [vmem:[%s2929_s14 + $0x8] sm:$0xff]  ;;  %v596_v32 = vld [vmem:[#allocation2 + $0x2d8] sm:$0xff]  ;;  %v2126_v33 = vpack.c.bf16 %v550_v24, %v542_v23  ;;  %v549_v35 = vld [vmem:[#allocation2 + $0x160] sm:$0xff] }
  0xbb   : > { %v558_v36 = vld [vmem:[#allocation2 + $0x1a8] sm:$0xff]  ;;  %v2106_v39 = vpack.c.bf16 %v596_v32, %v588_v31  ;;  %v595_v41 = vld [vmem:[#allocation2 + $0x2d0] sm:$0xff]  ;;  %v2128_v42 = vpack.c.bf16 %v549_v35, %v541_v34  ;;  %v604_v43 = vld [vmem:[#allocation2 + $0x318] sm:$0xff] }
  0xbc   : > { %v566_v37 = vld [vmem:[#allocation2 + $0x1e8] sm:$0xff]  ;;  %v612_v44 = vld [vmem:[#allocation2 + $0x358] sm:$0xff]  ;;  %v557_v46 = vld [vmem:[#allocation2 + $0x1a0] sm:$0xff] }
  0xbd   : > { %2077 = vmatpush1.bf16.msra.mxu0 %v2076_v38  ;;  %v2104_v38 = vpack.c.bf16 %v579_v28, %v571_v27  ;;  %v2130_v45 = vpack.c.bf16 %v566_v37, %v558_v36  ;;  %v565_v47 = vld [vmem:[#allocation2 + $0x1e0] sm:$0xff]  ;;  %v574_v48 = vld [vmem:[#allocation2 + $0x228] sm:$0xff]  ;;  %v603_v52 = vld [vmem:[#allocation2 + $0x310] sm:$0xff] }
  0xbe   : > { %2079 = vmatprep.subr.bf16.mxu0 %v2078_v40  ;;  %v587_v40 = vld [vmem:[#allocation2 + $0x290] sm:$0xff]  ;;  %v582_v49 = vld [vmem:[#allocation2 + $0x268] sm:$0xff]  ;;  %v2132_v54 = vpack.c.bf16 %v565_v47, %v557_v46  ;;  %v620_v55 = vld [vmem:[#allocation2 + $0x398] sm:$0xff] }
  0xbf   : > { %2105 = vmatpush1.bf16.msra.mxu1 %v2104_v38  ;;  %v2108_v50 = vpack.c.bf16 %v595_v41, %v587_v40  ;;  %v611_v53 = vld [vmem:[#allocation2 + $0x350] sm:$0xff]  ;;  %v628_v56 = vld [vmem:[#allocation2 + $0x3d8] sm:$0xff]  ;;  %v573_v58 = vld [vmem:[#allocation2 + $0x220] sm:$0xff] }
  0xc0   : > { %2107 = vmatprep.subr.bf16.mxu1 %v2106_v39  ;;  %v581_v59 = vld [vmem:[#allocation2 + $0x260] sm:$0xff]  ;;  %v590_v60 = vld [vmem:[#allocation2 + $0x2a8] sm:$0xff]  ;;  %v2112_v62 = vpack.c.bf16 %v611_v53, %v603_v52  ;;  %v2114_v63 = vpack.c.bf16 %v628_v56, %v620_v55  ;;  %v619_v1 = vld [vmem:[#allocation2 + $0x390] sm:$0xff] }
  0xc1   : > { %2081 = vmatpush1.bf16.msra.mxu0 %v2080_v51  ;;  %v2110_v51 = vpack.c.bf16 %v612_v44, %v604_v43  ;;  %v598_v61 = vld [vmem:[#allocation2 + $0x2e8] sm:$0xff]  ;;  %v627_v2 = vld [vmem:[#allocation2 + $0x3d0] sm:$0xff]  ;;  %v2136_v3 = vpack.c.bf16 %v581_v59, %v573_v58  ;;  %v520_v5 = vld [vmem:[#allocation2 + $0x78] sm:$0xff] }
  0xc2   : > { %2083 = vmatprep.subr.bf16.mxu0 %v2082_v57  ;;  %v2134_v57 = vpack.c.bf16 %v582_v49, %v574_v48  ;;  %v2138_v6 = vpack.c.bf16 %v598_v61, %v590_v60  ;;  %v597_v8 = vld [vmem:[#allocation2 + $0x2e0] sm:$0xff]  ;;  %v606_v9 = vld [vmem:[#allocation2 + $0x328] sm:$0xff]  ;;  %v2116_v11 = vpack.c.bf16 %v627_v2, %v619_v1  ;;  %v511_v13 = vld [vmem:[#allocation2 + $0x30] sm:$0xff] }
  0xc3   : > { %2109 = vmatpush1.bf16.msra.mxu1 %v2108_v50  ;;  %v614_v10 = vld [vmem:[#allocation2 + $0x368] sm:$0xff]  ;;  %v519_v14 = vld [vmem:[#allocation2 + $0x70] sm:$0xff]  ;;  %v536_v18 = vld [vmem:[#allocation2 + $0xf8] sm:$0xff] }
  0xc4   : > { %2111 = vmatprep.subr.bf16.mxu1 %v2110_v51  ;;  %v2142_v19 = vpack.c.bf16 %v614_v10, %v606_v9  ;;  %v613_v21 = vld [vmem:[#allocation2 + $0x360] sm:$0xff]  ;;  %v622_v22 = vld [vmem:[#allocation2 + $0x3a8] sm:$0xff]  ;;  %v2152_v24 = vpack.c.bf16 %v519_v14, %v511_v13  ;;  %v527_v26 = vld [vmem:[#allocation2 + $0xb0] sm:$0xff] }
  0xc5   : > { %2085 = vmatpush1.bf16.msra.mxu0 %v2084_v4  ;;  %v512_v4 = vld [vmem:[#allocation2 + $0x38] sm:$0xff]  ;;  %v630_v23 = vld [vmem:[#allocation2 + $0x3e8] sm:$0xff]  ;;  %v535_v27 = vld [vmem:[#allocation2 + $0xf0] sm:$0xff] }
  0xc6   : > { %2119 = vmatprep.subr.bf16.mxu0 %v2118_v7  ;;  %v589_v7 = vld [vmem:[#allocation2 + $0x2a0] sm:$0xff]  ;;  %v2150_v12 = vpack.c.bf16 %v520_v5, %v512_v4  ;;  %v552_v31 = vld [vmem:[#allocation2 + $0x178] sm:$0xff]  ;;  %v2146_v32 = vpack.c.bf16 %v630_v23, %v622_v22  ;;  %v990_v36 = vld [vmem:[%s3080_s3 + $0x8] sm:$0xff]  ;;  %v2156_v37 = vpack.c.bf16 %v535_v27, %v527_v26 }
  0xc7   : > { %2113 = vmatpush1.bf16.msra.mxu1 %v2112_v62  ;;  %v2140_v15 = vpack.c.bf16 %v597_v8, %v589_v7  ;;  %v629_v34 = vld [vmem:[#allocation2 + $0x3e0] sm:$0xff]  ;;  %v543_v39 = vld [vmem:[#allocation2 + $0x130] sm:$0xff]  ;;  %v568_v43 = vld [vmem:[#allocation2 + $0x1f8] sm:$0xff] }
  0xc8   : > { %742 = vmatmul.mubr.f32.vlgmr.msra.gmra.mrb[0].mxu0 %v2932_v16  ;;  %2115 = vmatprep.subr.bf16.mxu1 %v2114_v63  ;;  %v989_v35 = vld [vmem:[%s3080_s3] sm:$0xff]  ;;  %v551_v40 = vld [vmem:[#allocation2 + $0x170] sm:$0xff]  ;;  %v992_v46 = vld [vmem:[%s3080_s3 + $0x18] sm:$0xff] }
  0xc9   : > { %2121 = vmatpush1.bf16.msra.mxu0 %v2120_v17  ;;  %747 = vmatprep.mubr.f32.mxu0 %v2650_v0  ;;  %v528_v17 = vld [vmem:[#allocation2 + $0xb8] sm:$0xff]  ;;  %v2182_v44 = vpack.c.bf16 %v990_v36, %v989_v35  ;;  %v2160_v47 = vpack.c.bf16 %v551_v40, %v543_v39  ;;  %v559_v49 = vld [vmem:[#allocation2 + $0x1b0] sm:$0xff]  ;;  %v994_v55 = vld [vmem:[%s3080_s3 + $0x28] sm:$0xff] }
  0xca   : > { %2123 = vmatprep.subr.bf16.mxu0 %v2122_v20  ;;  %v605_v20 = vld [vmem:[#allocation2 + $0x320] sm:$0xff]  ;;  %v2154_v25 = vpack.c.bf16 %v536_v18, %v528_v17  ;;  %v567_v50 = vld [vmem:[#allocation2 + $0x1f0] sm:$0xff]  ;;  %v576_v51 = vld [vmem:[#allocation2 + $0x238] sm:$0xff] }
  0xcb   : > { %2117 = vmatpush1.bf16.msra.mxu1 %v2116_v11  ;;  %v2144_v28 = vpack.c.bf16 %v613_v21, %v605_v20  ;;  %v584_v52 = vld [vmem:[#allocation2 + $0x278] sm:$0xff]  ;;  %v2164_v56 = vpack.c.bf16 %v567_v50, %v559_v49  ;;  %v575_v58 = vld [vmem:[#allocation2 + $0x230] sm:$0xff]  ;;  %v997_v7 = vld [vmem:[%s3080_s3 + $0x40] sm:$0xff] }
  0xcc   : > { %748 = vmatmul.mubr.f32.gmra.mrb[2].mxu0 %v2937_v29  ;;  %2151 = vmatprep.subr.bf16.mxu1 %v2150_v12  ;;  %v583_v59 = vld [vmem:[#allocation2 + $0x270] sm:$0xff]  ;;  %v592_v60 = vld [vmem:[#allocation2 + $0x2b8] sm:$0xff]  ;;  %v998_v8 = vld [vmem:[%s3080_s3 + $0x48] sm:$0xff] }
  0xcd   : > { %2125 = vmatpush1.bf16.msra.mxu0 %v2124_v30  ;;  %895 = vmatprep.mubr.f32.mxu0 %v2650_v0  ;;  %v544_v30 = vld [vmem:[#allocation2 + $0x138] sm:$0xff]  ;;  %v995_v63 = vld [vmem:[%s3080_s3 + $0x30] sm:$0xff]  ;;  %v2168_v2 = vpack.c.bf16 %v583_v59, %v575_v58  ;;  %v2198_v10 = vpack.c.bf16 %v998_v8, %v997_v7  ;;  %v1001_v17 = vld [vmem:[%s3080_s3 + $0x60] sm:$0xff]  ;;  %v637_v58 = vlaneseq }
  0xce   : > { %2127 = vmatprep.subr.bf16.mxu0 %v2126_v33  ;;  %v621_v33 = vld [vmem:[#allocation2 + $0x3a0] sm:$0xff]  ;;  %819 = vmatmul.mubr.f32.vlgmr.msra.gmra.mrb[0].mxu1 %v2932_v16  ;;  %v2158_v38 = vpack.c.bf16 %v552_v31, %v544_v30  ;;  %v600_v61 = vld [vmem:[#allocation2 + $0x2f8] sm:$0xff]  ;;  %v591_v4 = vld [vmem:[#allocation2 + $0x2b0] sm:$0xff] }
  0xcf   : > { %2153 = vmatpush1.bf16.msra.mxu1 %v2152_v24  ;;  %824 = vmatprep.mubr.f32.mxu1 %v2650_v0  ;;  %v2148_v41 = vpack.c.bf16 %v629_v34, %v621_v33  ;;  %v996_v1 = vld [vmem:[%s3080_s3 + $0x38] sm:$0xff]  ;;  %v599_v5 = vld [vmem:[#allocation2 + $0x2f0] sm:$0xff]  ;;  %v1005_v34 = vld [vmem:[#allocation4] sm:$0xff]  ;;  %v3000_v59 = vshrl.u32 %v637_v58, 7 }
  0xd0   : > { %2155 = vmatprep.subr.bf16.mxu1 %v2154_v25  ;;  %v2172_v9 = vpack.c.bf16 %v599_v5, %v591_v4  ;;  %v999_v11 = vld [vmem:[%s3080_s3 + $0x50] sm:$0xff]  ;;  %v1000_v12 = vld [vmem:[%s3080_s3 + $0x58] sm:$0xff]  ;;  %v1006_v35 = vld [vmem:[#allocation4 + $0x8] sm:$0xff] }
  0xd1   : > { %2129 = vmatpush1.bf16.msra.mxu0 %v2128_v42  ;;  %v560_v42 = vld [vmem:[#allocation2 + $0x1b8] sm:$0xff]  ;;  %v2202_v13 = vpack.c.bf16 %v1000_v12, %v999_v11  ;;  %v607_v20 = vld [vmem:[#allocation2 + $0x330] sm:$0xff]  ;;  %v2214_v36 = vpack.c.bf16 %v1006_v35, %v1005_v34  ;;  %v1009_v39 = vld [vmem:[#allocation4 + $0x20] sm:$0xff] }
  0xd2   : > { %2131 = vmatprep.subr.bf16.mxu0 %v2130_v45  ;;  %825 = vmatmul.mubr.f32.gmra.mrb[2].mxu1 %v2937_v29  ;;  %v991_v45 = vld [vmem:[%s3080_s3 + $0x10] sm:$0xff]  ;;  %v2162_v48 = vpack.c.bf16 %v568_v43, %v560_v42  ;;  %v608_v14 = vld [vmem:[#allocation2 + $0x338] sm:$0xff]  ;;  %v1179_v11 = vld [vmem:[#allocation6 + $0x20] sm:$0xff] }
  0xd3   : > { %2157 = vmatpush1.bf16.msra.mxu1 %v2156_v37  ;;  %972 = vmatprep.mubr.f32.mxu1 %v2650_v0  ;;  %v2186_v53 = vpack.c.bf16 %v992_v46, %v991_v45  ;;  %v615_v21 = vld [vmem:[#allocation2 + $0x370] sm:$0xff]  ;;  %v624_v24 = vld [vmem:[#allocation2 + $0x3b8] sm:$0xff]  ;;  %v1013_v46 = vld [vmem:[#allocation4 + $0x40] sm:$0xff] }
  0xd4   : > { %2159 = vmatprep.subr.bf16.mxu1 %v2158_v38  ;;  %v2176_v23 = vpack.c.bf16 %v615_v21, %v607_v20  ;;  %v632_v25 = vld [vmem:[#allocation2 + $0x3f8] sm:$0xff]  ;;  %v1003_v26 = vld [vmem:[%s3080_s3 + $0x70] sm:$0xff]  ;;  %v1180_v12 = vld [vmem:[#allocation6 + $0x28] sm:$0xff] }
  0xd5   : > { %2133 = vmatpush1.bf16.msra.mxu0 %v2132_v54  ;;  %v993_v54 = vld [vmem:[%s3080_s3 + $0x20] sm:$0xff]  ;;  %v2178_v27 = vpack.c.bf16 %v632_v25, %v624_v24  ;;  %v623_v30 = vld [vmem:[#allocation2 + $0x3b0] sm:$0xff]  ;;  %v1008_v38 = vld [vmem:[#allocation4 + $0x18] sm:$0xff] }
  0xd6   : > { %2135 = vmatprep.subr.bf16.mxu0 %v2134_v57  ;;  %v2166_v57 = vpack.c.bf16 %v584_v52, %v576_v51  ;;  %v2190_v62 = vpack.c.bf16 %v994_v55, %v993_v54  ;;  %v631_v31 = vld [vmem:[#allocation2 + $0x3f0] sm:$0xff]  ;;  %v1016_v49 = vld [vmem:[#allocation4 + $0x58] sm:$0xff]  ;;  %v1018_v51 = vld [vmem:[#allocation4 + $0x68] sm:$0xff] }
  0xd7   : > { %2161 = vmatpush1.bf16.msra.mxu1 %v2160_v47  ;;  %v2180_v33 = vpack.c.bf16 %v631_v31, %v623_v30  ;;  %v1007_v37 = vld [vmem:[#allocation4 + $0x10] sm:$0xff]  ;;  %v1175_v55 = vld [vmem:[#allocation6] sm:$0xff] }
  0xd8   : > { %2163 = vmatprep.subr.bf16.mxu1 %v2162_v48  ;;  %v2218_v40 = vpack.c.bf16 %v1008_v38, %v1007_v37  ;;  %v1011_v43 = vld [vmem:[#allocation4 + $0x30] sm:$0xff] }
  0xd9   : > { %2137 = vmatpush1.bf16.msra.mxu0 %v2136_v3  ;;  %v2170_v3 = vpack.c.bf16 %v600_v61, %v592_v60  ;;  %v1015_v48 = vld [vmem:[#allocation4 + $0x50] sm:$0xff]  ;;  %v639_v60 = vsub.s32 0, %v3000_v59  ;;  %v3006_v61 = vld [vmem:[%s3079_s2] sm:$0xff] }
  0xda   : > { %2139 = vmatprep.subr.bf16.mxu0 %v2138_v6  ;;  %v2194_v6 = vpack.c.bf16 %v996_v1, %v995_v63  ;;  %v2234_v50 = vpack.c.bf16 %v1016_v49, %v1015_v48  ;;  %v1177_v5 = vld [vmem:[#allocation6 + $0x10] sm:$0xff] }
  0xdb   : > { %2165 = vmatpush1.bf16.msra.mxu1 %v2164_v56  ;;  %v1176_v56 = vld [vmem:[#allocation6 + $0x8] sm:$0xff]  ;;  %v1185_v21 = vld [vmem:[#allocation6 + $0x50] sm:$0xff] }
  0xdc   : > { %2167 = vmatprep.subr.bf16.mxu1 %v2166_v57  ;;  %v2246_v57 = vpack.c.bf16 %v1176_v56, %v1175_v55  ;;  %v1193_v49 = vld [vmem:[#allocation7 + $0x10] sm:$0xff]  ;;  %v1198_v56 = vld [vmem:[#allocation7 + $0x38] sm:$0xff] }
  0xdd   : > { %2141 = vmatpush1.bf16.msra.mxu0 %v2140_v15  ;;  %v616_v15 = vld [vmem:[#allocation2 + $0x378] sm:$0xff]  ;;  %v1197_v55 = vld [vmem:[#allocation7 + $0x30] sm:$0xff] }
  0xde   : > { %2143 = vmatprep.subr.bf16.mxu0 %v2142_v19  ;;  %v2174_v18 = vpack.c.bf16 %v616_v15, %v608_v14  ;;  %v1002_v19 = vld [vmem:[%s3080_s3 + $0x68] sm:$0xff]  ;;  %v1181_v14 = vld [vmem:[#allocation6 + $0x30] sm:$0xff]  ;;  %v1182_v15 = vld [vmem:[#allocation6 + $0x38] sm:$0xff] }
  0xdf   : > { %2169 = vmatpush1.bf16.msra.mxu1 %v2168_v2  ;;  %v2206_v22 = vpack.c.bf16 %v1002_v19, %v1001_v17  ;;  %v2258_v17 = vpack.c.bf16 %v1182_v15, %v1181_v14  ;;  %v1184_v19 = vld [vmem:[#allocation6 + $0x48] sm:$0xff]  ;;  %v643_v15 = vsub.s32 1, %v3000_v59 }
  0xe0   : > { %2171 = vmatprep.subr.bf16.mxu1 %v2170_v3 }
  0xe1   : > { %2145 = vmatpush1.bf16.msra.mxu0 %v2144_v28  ;;  %v1004_v28 = vld [vmem:[%s3080_s3 + $0x78] sm:$0xff] }
  0xe2   : > { %2147 = vmatprep.subr.bf16.mxu0 %v2146_v32  ;;  %v2210_v32 = vpack.c.bf16 %v1004_v28, %v1003_v26  ;;  %v1187_v26 = vld [vmem:[#allocation6 + $0x60] sm:$0xff]  ;;  %v655_v28 = vsub.s32 4, %v3000_v59 }
  0xe3   : > { %2173 = vmatpush1.bf16.msra.mxu1 %v2172_v9 }
  0xe4   : > { %2175 = vmatprep.subr.bf16.mxu1 %v2174_v18  ;;  %v1183_v18 = vld [vmem:[#allocation6 + $0x40] sm:$0xff] }
  0xe5   : > { %2149 = vmatpush1.bf16.msra.mxu0 %v2148_v41  ;;  %v1010_v41 = vld [vmem:[#allocation4 + $0x28] sm:$0xff]  ;;  %v2262_v20 = vpack.c.bf16 %v1184_v19, %v1183_v18 }
  0xe6   : > { %2183 = vmatprep.subr.bf16.mxu0 %v2182_v44  ;;  %v2222_v42 = vpack.c.bf16 %v1010_v41, %v1009_v39 }
  0xe7   : > { %2177 = vmatpush1.bf16.msra.mxu1 %v2176_v23 }
  0xe8   : > { %896 = vmatmul.mubr.f32.vlgmr.msra.gmra.mrb[4].mxu0 %v2932_v16  ;;  %2179 = vmatprep.subr.bf16.mxu1 %v2178_v27  ;;  %v1188_v27 = vld [vmem:[#allocation6 + $0x68] sm:$0xff] }
  0xe9   : > { %901 = vmatprep.mubr.f32.mxu0 %v2650_v0  ;;  %2185 = vmatpush3.bf16.msra.mxu0 %v2182_v44  ;;  %v1012_v44 = vld [vmem:[#allocation4 + $0x38] sm:$0xff] }
  0xea   : > { %2187 = vmatprep.subr.bf16.mxu0 %v2186_v53  ;;  %v2226_v45 = vpack.c.bf16 %v1012_v44, %v1011_v43  ;;  %v1189_v43 = vld [vmem:[#allocation6 + $0x70] sm:$0xff]  ;;  %v1190_v44 = vld [vmem:[#allocation6 + $0x78] sm:$0xff] }
  0xeb   : > { %2181 = vmatpush1.bf16.msra.mxu1 %v2180_v33  ;;  %v656_v33 = vrot.slane %v3006_v61, %v655_v28 }
  0xec   : > { %902 = vmatmul.mubr.f32.gmra.mrb[6].mxu0 %v2937_v29  ;;  %2215 = vmatprep.subr.bf16.mxu1 %v2214_v36 }
  0xed   : > { %2189 = vmatpush3.bf16.msra.mxu0 %v2186_v53  ;;  %v1020_v53 = vld [vmem:[#allocation4 + $0x78] sm:$0xff] }
  0xee   : > { %2191 = vmatprep.subr.bf16.mxu0 %v2190_v62  ;;  %973 = vmatmul.mubr.f32.vlgmr.msra.gmra.mrb[4].mxu1 %v2932_v16  ;;  %v1014_v16 = vld [vmem:[#allocation4 + $0x48] sm:$0xff] }
  0xef   : > { %2217 = vmatpush3.bf16.msra.mxu1 %v2214_v36  ;;  %978 = vmatprep.mubr.f32.mxu1 %v2650_v0  ;;  %v2230_v47 = vpack.c.bf16 %v1014_v16, %v1013_v46  ;;  %v1017_v0 = vld [vmem:[#allocation4 + $0x60] sm:$0xff]  ;;  %v2274_v46 = vpack.c.bf16 %v1190_v44, %v1189_v43  ;;  %v1371_v44 = vld [vmem:[#allocation9 + $0x50] sm:$0xff] }
  0xf0   : > { %2219 = vmatprep.subr.bf16.mxu1 %v2218_v40  ;;  %v2238_v52 = vpack.c.bf16 %v1018_v51, %v1017_v0  ;;  %v1191_v16 = vld [vmem:[#allocation7] sm:$0xff] }
  0xf1   : > { %2193 = vmatpush3.bf16.msra.mxu0 %v2190_v62  ;;  %v640_v62 = vrot.slane %v3006_v61, %v639_v60  ;;  %v1195_v0 = vld [vmem:[#allocation7 + $0x20] sm:$0xff] }
  0xf2   : > { %2195 = vmatprep.subr.bf16.mxu0 %v2194_v6  ;;  %979 = vmatmul.mubr.f32.gmra.mrb[6].mxu1 %v2937_v29  ;;  %v1019_v29 = vld [vmem:[#allocation4 + $0x70] sm:$0xff]  ;;  %v1199_v60 = vld [vmem:[#allocation7 + $0x40] sm:$0xff] }
  0xf3   : > { %2221 = vmatpush3.bf16.msra.mxu1 %v2218_v40  ;;  %v2242_v54 = vpack.c.bf16 %v1020_v53, %v1019_v29  ;;  %v1196_v29 = vld [vmem:[#allocation7 + $0x28] sm:$0xff] }
  0xf4   : > { %2223 = vmatprep.subr.bf16.mxu1 %v2222_v42 }
  0xf5   : > { %2197 = vmatpush3.bf16.msra.mxu0 %v2194_v6  ;;  %v1178_v6 = vld [vmem:[#allocation6 + $0x18] sm:$0xff] }
  0xf6   : > { %2199 = vmatprep.subr.bf16.mxu0 %v2198_v10 }
  0xf7   : > { %2225 = vmatpush3.bf16.msra.mxu1 %v2222_v42 }
  0xf8   : > { %2227 = vmatprep.subr.bf16.mxu1 %v2226_v45 }
  0xf9   : > { %2201 = vmatpush3.bf16.msra.mxu0 %v2198_v10  ;;  %v2250_v10 = vpack.c.bf16 %v1178_v6, %v1177_v5  ;;  %v1203_v5 = vld [vmem:[#allocation7 + $0x60] sm:$0xff]  ;;  %v1204_v6 = vld [vmem:[#allocation7 + $0x68] sm:$0xff] }
  0xfa   : > { %2203 = vmatprep.subr.bf16.mxu0 %v2202_v13 }
  0xfb   : > { %2229 = vmatpush3.bf16.msra.mxu1 %v2226_v45 }
  0xfc   : > { %2231 = vmatprep.subr.bf16.mxu1 %v2230_v47 }
  0xfd   : > { %2205 = vmatpush3.bf16.msra.mxu0 %v2202_v13  ;;  %v2254_v13 = vpack.c.bf16 %v1180_v12, %v1179_v11  ;;  %v1361_v12 = vld [vmem:[#allocation9] sm:$0xff] }
  0xfe   : > { %2207 = vmatprep.subr.bf16.mxu0 %v2206_v22 }
  0xff   : > { %2233 = vmatpush3.bf16.msra.mxu1 %v2230_v47  ;;  %v1192_v47 = vld [vmem:[#allocation7 + $0x8] sm:$0xff] }
 0x100   : > { %2235 = vmatprep.subr.bf16.mxu1 %v2234_v50  ;;  %v2278_v48 = vpack.c.bf16 %v1192_v47, %v1191_v16  ;;  %v1373_v47 = vld [vmem:[#allocation9 + $0x60] sm:$0xff] }
 0x101   : > { %2209 = vmatpush3.bf16.msra.mxu0 %v2206_v22  ;;  %v1186_v22 = vld [vmem:[#allocation6 + $0x58] sm:$0xff] }
 0x102   : > { %2211 = vmatprep.subr.bf16.mxu0 %v2210_v32  ;;  %v2266_v25 = vpack.c.bf16 %v1186_v22, %v1185_v21 }
 0x103   : > { %2237 = vmatpush3.bf16.msra.mxu1 %v2234_v50  ;;  %v1194_v50 = vld [vmem:[#allocation7 + $0x18] sm:$0xff] }
 0x104   : > { %2239 = vmatprep.subr.bf16.mxu1 %v2238_v52 }
 0x105   : > { %2213 = vmatpush3.bf16.msra.mxu0 %v2210_v32  ;;  %v2270_v32 = vpack.c.bf16 %v1188_v27, %v1187_v26  ;;  %v1363_v26 = vld [vmem:[#allocation9 + $0x10] sm:$0xff]  ;;  %v1364_v27 = vld [vmem:[#allocation9 + $0x18] sm:$0xff] }
 0x106   : > { %2247 = vmatprep.subr.bf16.mxu0 %v2246_v57 }
 0x107   : > { %2241 = vmatpush3.bf16.msra.mxu1 %v2238_v52  ;;  %v2282_v52 = vpack.c.bf16 %v1194_v50, %v1193_v49  ;;  %v659_v49 = vsub.s32 5, %v3000_v59 }
 0x108   : > { %2243 = vmatprep.subr.bf16.mxu1 %v2242_v54 }
 0x10b   : > { %2245 = vmatpush3.bf16.msra.mxu1 %v2242_v54  ;;  %v2286_v54 = vpack.c.bf16 %v1196_v29, %v1195_v0  ;;  %v660_v0 = vrot.slane %v3006_v61, %v659_v49 }
 0x10c   : > { %2279 = vmatprep.subr.bf16.mxu1 %v2278_v48 }
 0x19b   : > { %v743_v63 = vpop.f32.mrb[0].mxu0 }
 0x19c   : > { %v744_v1 = vadd.f32 %v743_v63, %v640_v62  ;;  %v3009_v2 = vpop.f32.mrb[1].mxu0 }
 0x19e   : > { %v985_v3 = vmax.f32 %v744_v1, 0.0  ;;  %v1201_v1 = vld [vmem:[#allocation7 + $0x50] sm:$0xff] }
 0x19f   : > { %v749_v4 = vpop.f32.mrb[2].mxu0 }
 0x1a0   : > { %v750_v7 = vadd.f32 %v749_v4, %v640_v62  ;;  %1876 = vmatprep.mubr.f32.mxu0 %v985_v3  ;;  %v3011_v8 = vpop.f32.mrb[3].mxu0  ;;  %v1200_v62 = vld [vmem:[#allocation7 + $0x48] sm:$0xff]  ;;  %v1202_v3 = vld [vmem:[#allocation7 + $0x58] sm:$0xff] }
 0x1a1   : > { %v3013_v23 = vpop.f32.mrb[0].mxu1  ;;  %v2294_v63 = vpack.c.bf16 %v1200_v62, %v1199_v60  ;;  %v2298_v4 = vpack.c.bf16 %v1202_v3, %v1201_v1  ;;  %v1376_v1 = vld [vmem:[#allocation9 + $0x78] sm:$0xff] }
 0x1a2   : > { %v986_v9 = vmax.f32 %v750_v7, 0.0  ;;  %v3015_v24 = vpop.f32.mrb[1].mxu1  ;;  %v2302_v7 = vpack.c.bf16 %v1204_v6, %v1203_v5  ;;  %v1378_v5 = vld [vmem:[#allocation10 + $0x8] sm:$0xff] }
 0x1a4   : > { %1877 = vmatmul.mubr.f32.vlgmr.msra.gmra.mrb[8].mxu0 %v986_v9  ;;  %v1205_v9 = vld [vmem:[#allocation7 + $0x70] sm:$0xff] }
 0x1a5   : > { %2249 = vmatpush3.bf16.msra.mxu0 %v2246_v57  ;;  %v3018_v30 = vpop.f32.mrb[2].mxu1  ;;  %v2290_v57 = vpack.c.bf16 %v1198_v56, %v1197_v55 }
 0x1a6   : > { %2251 = vmatprep.subr.bf16.mxu0 %v2250_v10  ;;  %v3020_v31 = vpop.f32.mrb[3].mxu1 }
 0x1a9   : > { %2253 = vmatpush3.bf16.msra.mxu0 %v2250_v10  ;;  %v1206_v10 = vld [vmem:[#allocation7 + $0x78] sm:$0xff] }
 0x1aa   : > { %2255 = vmatprep.subr.bf16.mxu0 %v2254_v13  ;;  %v2306_v11 = vpack.c.bf16 %v1206_v10, %v1205_v9  ;;  %v1382_v10 = vld [vmem:[#allocation10 + $0x28] sm:$0xff] }
 0x1ad   : > { %2257 = vmatpush3.bf16.msra.mxu0 %v2254_v13  ;;  %v1362_v13 = vld [vmem:[#allocation9 + $0x8] sm:$0xff] }
 0x1ae   : > { %2259 = vmatprep.subr.bf16.mxu0 %v2258_v17  ;;  %v2310_v14 = vpack.c.bf16 %v1362_v13, %v1361_v12  ;;  %v1383_v12 = vld [vmem:[#allocation10 + $0x30] sm:$0xff]  ;;  %v1384_v13 = vld [vmem:[#allocation10 + $0x38] sm:$0xff] }
 0x1b1   : > { %2261 = vmatpush3.bf16.msra.mxu0 %v2258_v17  ;;  %v644_v17 = vrot.slane %v3006_v61, %v643_v15  ;;  %v1385_v15 = vld [vmem:[#allocation10 + $0x40] sm:$0xff] }
 0x1b2   : > { %2263 = vmatprep.subr.bf16.mxu0 %v2262_v20 }
 0x1b3   : > { %v752_v18 = vadd.f32 %v3011_v8, %v644_v17  ;;  %v746_v19 = vadd.f32 %v3009_v2, %v644_v17  ;;  %v1368_v8 = vld [vmem:[#allocation9 + $0x38] sm:$0xff]  ;;  %v1386_v17 = vld [vmem:[#allocation10 + $0x48] sm:$0xff] }
 0x1b5   : > { %2265 = vmatpush3.bf16.msra.mxu0 %v2262_v20 }
 0x1b6   : > { %2267 = vmatprep.subr.bf16.mxu0 %v2266_v25 }
 0x1b9   : > { %2269 = vmatpush3.bf16.msra.mxu0 %v2266_v25 }
 0x1ba   : > { %2271 = vmatprep.subr.bf16.mxu0 %v2270_v32 }
 0x1bb   : > { %v897_v34 = vpop.f32.mrb[4].mxu0 }
 0x1bc   : > { %v898_v35 = vadd.f32 %v897_v34, %v656_v33  ;;  %v3023_v36 = vpop.f32.mrb[5].mxu0  ;;  %v1365_v34 = vld [vmem:[#allocation9 + $0x20] sm:$0xff] }
 0x1bd   : > { %2273 = vmatpush3.bf16.msra.mxu0 %v2270_v32  ;;  %v900_v29 = vadd.f32 %v3023_v36, %v660_v0  ;;  %v1380_v36 = vld [vmem:[#allocation10 + $0x18] sm:$0xff] }
 0x1be   : > { %v987_v37 = vmax.f32 %v898_v35, 0.0  ;;  %2275 = vmatprep.subr.bf16.mxu0 %v2274_v46  ;;  %v1366_v35 = vld [vmem:[#allocation9 + $0x28] sm:$0xff] }
 0x1bf   : > { %v903_v38 = vpop.f32.mrb[6].mxu0 }
 0x1c0   : > { %v904_v39 = vadd.f32 %v903_v38, %v656_v33  ;;  %v3025_v40 = vpop.f32.mrb[7].mxu0  ;;  %1911 = vmatprep.mubr.f32.mxu1 %v987_v37  ;;  %v2314_v33 = vpack.c.bf16 %v1364_v27, %v1363_v26  ;;  %v2318_v37 = vpack.c.bf16 %v1366_v35, %v1365_v34  ;;  %v1367_v38 = vld [vmem:[#allocation9 + $0x30] sm:$0xff] }
 0x1c1   : > { %v3027_v42 = vpop.f32.mrb[4].mxu1  ;;  %2277 = vmatpush3.bf16.msra.mxu0 %v2274_v46  ;;  %v2322_v2 = vpack.c.bf16 %v1368_v8, %v1367_v38  ;;  %v1372_v46 = vld [vmem:[#allocation9 + $0x58] sm:$0xff]  ;;  %v1391_v27 = vld [vmem:[#allocation10 + $0x70] sm:$0xff] }
 0x1c2   : > { %v988_v41 = vmax.f32 %v904_v39, 0.0  ;;  %v3029_v45 = vpop.f32.mrb[5].mxu1  ;;  %2311 = vmatprep.subr.bf16.mxu0 %v2310_v14  ;;  %v1369_v39 = vld [vmem:[#allocation9 + $0x40] sm:$0xff]  ;;  %v2330_v16 = vpack.c.bf16 %v1372_v46, %v1371_v44  ;;  %v663_v44 = vsub.s32 6, %v3000_v59 }
 0x1c4   : > { %1912 = vmatmul.mubr.f32.vlgmr.msra.gmra.mrb[8].mxu1 %v988_v41  ;;  %v1370_v41 = vld [vmem:[#allocation9 + $0x48] sm:$0xff]  ;;  %v664_v46 = vrot.slane %v3006_v61, %v663_v44 }
 0x1c5   : > { %v3031_v51 = vpop.f32.mrb[6].mxu1  ;;  %2281 = vmatpush3.bf16.msra.mxu1 %v2278_v48  ;;  %v2326_v43 = vpack.c.bf16 %v1370_v41, %v1369_v39  ;;  %v1374_v48 = vld [vmem:[#allocation9 + $0x68] sm:$0xff] }
 0x1c6   : > { %v3033_v53 = vpop.f32.mrb[7].mxu1  ;;  %2283 = vmatprep.subr.bf16.mxu1 %v2282_v52  ;;  %v2334_v50 = vpack.c.bf16 %v1374_v48, %v1373_v47  ;;  %v975_v47 = vadd.f32 %v3027_v42, %v664_v46 }
 0x1c9   : > { %2285 = vmatpush3.bf16.msra.mxu1 %v2282_v52  ;;  %v906_v52 = vadd.f32 %v3025_v40, %v660_v0  ;;  %v1379_v40 = vld [vmem:[#allocation10 + $0x10] sm:$0xff] }
 0x1ca   : > { %2287 = vmatprep.subr.bf16.mxu1 %v2286_v54  ;;  %v2346_v9 = vpack.c.bf16 %v1380_v36, %v1379_v40 }
 0x1cd   : > { %2289 = vmatpush3.bf16.msra.mxu1 %v2286_v54 }
 0x1ce   : > { %2291 = vmatprep.subr.bf16.mxu1 %v2290_v57 }
 0x1d1   : > { %2293 = vmatpush3.bf16.msra.mxu1 %v2290_v57 }
 0x1d2   : > { %2295 = vmatprep.subr.bf16.mxu1 %v2294_v63 }
 0x1d5   : > { %2297 = vmatpush3.bf16.msra.mxu1 %v2294_v63  ;;  %v1375_v63 = vld [vmem:[#allocation9 + $0x70] sm:$0xff] }
 0x1d6   : > { %2299 = vmatprep.subr.bf16.mxu1 %v2298_v4  ;;  %v2338_v3 = vpack.c.bf16 %v1376_v1, %v1375_v63 }
 0x1d9   : > { %2301 = vmatpush3.bf16.msra.mxu1 %v2298_v4  ;;  %v1377_v4 = vld [vmem:[#allocation10] sm:$0xff] }
 0x1da   : > { %2303 = vmatprep.subr.bf16.mxu1 %v2302_v7  ;;  %v2342_v6 = vpack.c.bf16 %v1378_v5, %v1377_v4  ;;  %v667_v4 = vsub.s32 7, %v3000_v59 }
 0x1dd   : > { %2305 = vmatpush3.bf16.msra.mxu1 %v2302_v7  ;;  %v1381_v7 = vld [vmem:[#allocation10 + $0x20] sm:$0xff] }
 0x1de   : > { %2307 = vmatprep.subr.bf16.mxu1 %v2306_v11 }
 0x1e1   : > { %2309 = vmatpush3.bf16.msra.mxu1 %v2306_v11  ;;  %v2350_v11 = vpack.c.bf16 %v1382_v10, %v1381_v7 }
 0x1e2   : > { %2343 = vmatprep.subr.bf16.mxu1 %v2342_v6 }
 0x277   : > { %v1878_v20 = vpop.f32.mrb[8].mxu0 }
 0x278   : > { %v1093_v21 = vadd.f32 %v1878_v20, %v752_v18  ;;  %v1087_v22 = vpop.f32.mrb[9].mxu0  ;;  %v2358_v18 = vpack.c.bf16 %v1386_v17, %v1385_v15  ;;  %v1388_v20 = vld [vmem:[#allocation10 + $0x58] sm:$0xff] }
 0x279   : > { %v1088_v25 = vadd.f32 %v1087_v22, %v746_v19  ;;  %v1387_v19 = vld [vmem:[#allocation10 + $0x50] sm:$0xff]  ;;  %v1389_v22 = vld [vmem:[#allocation10 + $0x60] sm:$0xff] }
 0x27a   : > { %v1097_v32 = vmax.f32 %v1093_v21, 0.0  ;;  %v2362_v21 = vpack.c.bf16 %v1388_v20, %v1387_v19  ;;  %v1733_v19 = vld [vmem:[%s3088_s11] ss:$0 sm:$0xff] }
 0x27b   : > { %v1096_v28 = vmax.f32 %v1088_v25, 0.0  ;;  %v1390_v25 = vld [vmem:[#allocation10 + $0x68] sm:$0xff] }
 0x27c   : > { %v2366_v26 = vpack.c.bf16 %v1390_v25, %v1389_v22 }
 0x27d   : > { %1946 = vmatprep.mubr.f32.mxu0 %v1096_v28  ;;  %v1392_v28 = vld [vmem:[#allocation10 + $0x78] sm:$0xff] }
 0x27e   : > { %1947 = vmatmul.mubr.f32.vlgmr.msra.gmra.mrb[10].mxu0 %v1097_v32  ;;  %v2370_v32 = vpack.c.bf16 %v1392_v28, %v1391_v27 }
 0x27f   : > { %2313 = vmatpush3.bf16.msra.mxu0 %v2310_v14  ;;  %v2354_v14 = vpack.c.bf16 %v1384_v13, %v1383_v12 }
 0x280   : > { %2315 = vmatprep.subr.bf16.mxu0 %v2314_v33 }
 0x283   : > { %2317 = vmatpush3.bf16.msra.mxu0 %v2314_v33  ;;  %v647_v33 = vsub.s32 2, %v3000_v59 }
 0x284   : > { %2319 = vmatprep.subr.bf16.mxu0 %v2318_v37 }
 0x285   : > { %v648_v34 = vrot.slane %v3006_v61, %v647_v33 }
 0x287   : > { %2321 = vmatpush3.bf16.msra.mxu0 %v2318_v37  ;;  %v827_v35 = vadd.f32 %v3018_v30, %v648_v34  ;;  %v821_v37 = vadd.f32 %v3013_v23, %v648_v34 }
 0x288   : > { %2323 = vmatprep.subr.bf16.mxu0 %v2322_v2 }
 0x28b   : > { %2325 = vmatpush3.bf16.msra.mxu0 %v2322_v2 }
 0x28c   : > { %2327 = vmatprep.subr.bf16.mxu0 %v2326_v43 }
 0x28f   : > { %2329 = vmatpush3.bf16.msra.mxu0 %v2326_v43 }
 0x290   : > { %2331 = vmatprep.subr.bf16.mxu0 %v2330_v16 }
 0x293   : > { %2333 = vmatpush3.bf16.msra.mxu0 %v2330_v16  ;;  %v981_v16 = vadd.f32 %v3031_v51, %v664_v46 }
 0x294   : > { %2335 = vmatprep.subr.bf16.mxu0 %v2334_v50 }
 0x297   : > { %v1913_v54 = vpop.f32.mrb[8].mxu1  ;;  %2337 = vmatpush3.bf16.msra.mxu0 %v2334_v50 }
 0x298   : > { %v1170_v55 = vadd.f32 %v1913_v54, %v906_v52  ;;  %v1164_v56 = vpop.f32.mrb[9].mxu1  ;;  %2339 = vmatprep.subr.bf16.mxu0 %v2338_v3  ;;  %v651_v52 = vsub.s32 3, %v3000_v59  ;;  %v1574_v59 = vand.u32 127, %v637_v58 }
 0x299   : > { %v1165_v57 = vadd.f32 %v1164_v56, %v900_v29 }
 0x29a   : > { %v1174_v62 = vmax.f32 %v1170_v55, 0.0  ;;  %v652_v29 = vrot.slane %v3006_v61, %v651_v52  ;;  %vm1575_vm0 = vcmp.eq.s32.totalorder %v1574_v59, 0  ;;  %vm1578_vm1 = vcmp.eq.s32.totalorder %v1574_v59, 1 }
 0x29b   : > { %v1173_v60 = vmax.f32 %v1165_v57, 0.0  ;;  %2341 = vmatpush3.bf16.msra.mxu0 %v2338_v3 }
 0x29c   : > { %v829_v54 = vadd.f32 %v3020_v31, %v652_v29  ;;  %v823_v55 = vadd.f32 %v3015_v24, %v652_v29  ;;  %v668_v31 = vrot.slane %v3006_v61, %v667_v4 }
 0x29d   : > { %1981 = vmatprep.mubr.f32.mxu1 %v1173_v60  ;;  %v1731_v60 = vld [vmem:[%s3086_s9] ss:$0 sm:$0xff] }
 0x29e   : > { %1982 = vmatmul.mubr.f32.vlgmr.msra.gmra.mrb[10].mxu1 %v1174_v62  ;;  %v983_v24 = vadd.f32 %v3033_v53, %v668_v31  ;;  %v977_v5 = vadd.f32 %v3029_v45, %v668_v31 }
 0x29f   : > { %2345 = vmatpush3.bf16.msra.mxu1 %v2342_v6 }
 0x2a0   : > { %2347 = vmatprep.subr.bf16.mxu1 %v2346_v9 }
 0x2a3   : > { %2349 = vmatpush3.bf16.msra.mxu1 %v2346_v9  ;;  %v1732_v9 = vld [vmem:[%s3087_s10] ss:$0 sm:$0xff] }
 0x2a4   : > { %2351 = vmatprep.subr.bf16.mxu1 %v2350_v11 }
 0x2a7   : > { %2353 = vmatpush3.bf16.msra.mxu1 %v2350_v11 }
 0x2a8   : > { %2355 = vmatprep.subr.bf16.mxu1 %v2354_v14 }
 0x2ab   : > { %2357 = vmatpush3.bf16.msra.mxu1 %v2354_v14 }
 0x2ac   : > { %2359 = vmatprep.subr.bf16.mxu1 %v2358_v18 }
 0x2af   : > { %2361 = vmatpush3.bf16.msra.mxu1 %v2358_v18 }
 0x2b0   : > { %2363 = vmatprep.subr.bf16.mxu1 %v2362_v21 }
 0x2b3   : > { %2365 = vmatpush3.bf16.msra.mxu1 %v2362_v21 }
 0x2b4   : > { %2367 = vmatprep.subr.bf16.mxu1 %v2366_v26 }
 0x2b7   : > { %2369 = vmatpush3.bf16.msra.mxu1 %v2366_v26 }
 0x2b8   : > { %2371 = vmatprep.subr.bf16.mxu1 %v2370_v32 }
 0x2bb   : > { %2373 = vmatpush3.bf16.msra.mxu1 %v2370_v32 }
 0x351   : > { %v1948_v38 = vpop.f32.mrb[10].mxu0 }
 0x352   : > { %v1279_v8 = vadd.f32 %v1948_v38, %v827_v35  ;;  %v1273_v2 = vpop.f32.mrb[11].mxu0 }
 0x353   : > { %v1274_v39 = vadd.f32 %v1273_v2, %v821_v37 }
 0x354   : > { %v1283_v43 = vmax.f32 %v1279_v8, 0.0 }
 0x355   : > { %v1282_v41 = vmax.f32 %v1274_v39, 0.0 }
 0x357   : > { %2016 = vmatprep.mubr.f32.mxu0 %v1282_v41 }
 0x358   : > { %2017 = vmatmul.mubr.f32.vlgmr.msra.gmra.mrb[12].mxu0 %v1283_v43 }
 0x371   : > { %v1983_v48 = vpop.f32.mrb[10].mxu1 }
 0x372   : > { %v1356_v30 = vadd.f32 %v1983_v48, %v981_v16  ;;  %v1350_v49 = vpop.f32.mrb[11].mxu1 }
 0x373   : > { %v1351_v23 = vadd.f32 %v1350_v49, %v975_v47 }
 0x374   : > { %v1360_v0 = vmax.f32 %v1356_v30, 0.0 }
 0x375   : > { %v1359_v50 = vmax.f32 %v1351_v23, 0.0 }
 0x377   : > { %2051 = vmatprep.mubr.f32.mxu1 %v1359_v50 }
 0x378   : > { %2052 = vmatmul.mubr.f32.vlgmr.msra.gmra.mrb[12].mxu1 %v1360_v0 }
 0x42b   : > { %v2018_v56 = vpop.f32.mrb[12].mxu0 }
 0x42c   : > { %v1465_v51 = vadd.f32 %v2018_v56, %v829_v54  ;;  %v1459_v57 = vpop.f32.mrb[13].mxu0 }
 0x42d   : > { %v1460_v42 = vadd.f32 %v1459_v57, %v823_v55 }
 0x42e   : > { %v1469_v62 = vmax.f32 %v1465_v51, 0.0 }
 0x42f   : > { %v1468_v63 = vmax.f32 %v1460_v42, 0.0 }
 0x430   : > { %v1555_v1 = vmul.f32 %v1731_v60, %v1469_v62 }
 0x431   : > { %v1554_v3 = vmul.f32 %v1731_v60, %v1468_v63 }
 0x432   : > { %1558 = vadd.xlane.f32.xlu1 %v1555_v1 }
 0x433   : > { %1556 = vadd.xlane.f32.xlu0 %v1554_v3 }
 0x44b   : > { %v2053_v6 = vpop.f32.mrb[12].mxu1 }
 0x44c   : > { %v1542_v40 = vadd.f32 %v2053_v6, %v983_v24  ;;  %v1536_v36 = vpop.f32.mrb[13].mxu1 }
 0x44d   : > { %v1537_v7 = vadd.f32 %v1536_v36, %v977_v5 }
 0x44e   : > { %v1546_v10 = vmax.f32 %v1542_v40, 0.0 }
 0x44f   : > { %v1545_v11 = vmax.f32 %v1537_v7, 0.0 }
 0x450   : > { %v1568_v12 = vmul.f32 %v1732_v9, %v1546_v10 }
 0x451   : > { %v1567_v13 = vmul.f32 %v1732_v9, %v1545_v11 }
 0x452   : > { %1571 = vadd.xlane.f32.xlu1 %v1568_v12 }
 0x453   : > { %1569 = vadd.xlane.f32.xlu0 %v1567_v13 }
 0x4bf   : > { %v1559_v61 = vpop.xlane.xlu1 %1558 }
 0x4c0   : > { %v1557_v53 = vpop.xlane.xlu0 %1556  ;;  %v1577_v14 = vsel %vm1575_vm0, %v1559_v61, 0.0 }
 0x4c1   : > { %v1576_v18 = vsel %vm1575_vm0, %v1557_v53, 0.0 }
 0x4df   : > { %v1572_v45 = vpop.xlane.xlu1 %1571 }
 0x4e0   : > { %v1580_v15 = vsel %vm1578_vm1, %v1572_v45, 0.0  ;;  %v1570_v17 = vpop.xlane.xlu0 %1569 }
 0x4e1   : > { %v1582_v20 = vadd.f32 %v1580_v15, %v1577_v14  ;;  %v1579_v21 = vsel %vm1578_vm1, %v1570_v17, 0.0 }
 0x4e2   : > { %v1581_v22 = vadd.f32 %v1579_v21, %v1576_v18 }
 0x4e3   : > { %v1591_v25 = vadd.f32 %v1733_v19, %v1582_v20 }
 0x4e4   : > { %v1590_v58 = vadd.f32 %v1733_v19, %v1581_v22 }
 0x4e5   : > { %1593 = vst [vmem:[%s503_s12 + $0x8] sm:$0xff] %v1591_v25 }
 0x4e6   : > { %1592 = vst [vmem:[%s503_s12] sm:$0xff] %v1590_v58 }
 0x4e7 PF: > { %s26_s21 = sadd.s32 1, %s2638_s21  }
 0x4e8   : > { %p23_p2 = scmp.ge.s32.totalorder %s26_s21, 5  }
 0x4ea   :  { %25 = sbr.rel (!%p23_p2) target bundleno = 6 (0x6), region = 123 }
 0x4f1   :  { %1616 = vsyncpa [#allocation3], 1 }
 0x4f2   :  { %1618 = vsyncpa [#allocation3 + $0x1], 1 }
 0x4f3   :  { %1619 = vsyncpa [#allocation5], 1 }
 0x4f4   :  { %1620 = vsyncpa [#allocation8], 1 }
 0x4f5   :  { %1621 = vsyncpa [#allocation11], 1 }

</bundles_post_ra>
